<compile_context>
chip_gen: v5e
topology: v5e:2x2
jax: 0.10.0
libtpu: 0.0.40
codegen_flags: <defaults>
</compile_context>

<pallas_src>
import jax
import jax.numpy as jnp
from jax import lax
from jax.experimental import pallas as pl
from jax.experimental.pallas import tpu as pltpu


def _adaptive_fm_kernel(x_ref, w_ref, b_ref, o_ref, xp_ref):
    # x_ref : (1, H, W, C)   input slab for batch element n (NHWC, input dtype)
    # w_ref : (3, 3, C) f32  depthwise filter; residual already folded into center tap
    # b_ref : (1, C)    f32  conv bias
    # o_ref : (1, H, W, C)   output slab
    # xp_ref: (H+2, W+2, C)  scratch in input dtype, 1-pixel halo
    H, W, C = x_ref.shape[1], x_ref.shape[2], x_ref.shape[3]
    dt = xp_ref.dtype

    # Zero only the halo strips (rows 0 / H+1, cols 0 / W+1), not the whole scratch.
    zrow = jnp.zeros((1, W + 2, C), dt)
    xp_ref[pl.ds(0, 1), :, :] = zrow
    xp_ref[pl.ds(H + 1, 1), :, :] = zrow
    zcol = jnp.zeros((H + 2, 1, C), dt)
    xp_ref[:, pl.ds(0, 1), :] = zcol
    xp_ref[:, pl.ds(W + 1, 1), :] = zcol

    # Copy the input into the interior (input dtype; no cast pass).
    xp_ref[pl.ds(1, H), pl.ds(1, W), :] = x_ref[0]

    w = w_ref[...]                          # (3, 3, C) f32, constant block (loaded once)
    b = b_ref[...].reshape(1, 1, C)         # (1, 1, C) f32

    # Accumulator starts at the bias; residual is in w[1,1,:] -> no extra passes later.
    acc = jnp.broadcast_to(b, (H, W, C)).astype(jnp.float32)

    # 3 column-shifted planes (one W-offset slice per kx) instead of 9 misaligned
    # per-tap slices; ky shifts are outer-axis slices of the loaded plane.
    for kx in range(3):
        plane = xp_ref[:, pl.ds(kx, W), :].astype(jnp.float32)   # (H+2, W, C)
        for ky in range(3):
            acc = acc + plane[ky:ky + H] * w[ky, kx].reshape(1, 1, C)

    o_ref[0] = acc.astype(o_ref.dtype)


def adaptive_fm(x, weight, bias):
    """AdaptiveFM forward: depthwise 3x3 conv (padding=1, groups=C) + residual.

    x: (N, C, H, W); weight: (C, 1, 3, 3); bias: (C,). Returns NCHW output.
    """
    N, C, H, W = x.shape

    # Layout plumbing: channels on the lane axis.
    x_nhwc = jnp.transpose(x, (0, 2, 3, 1))                                  # (N, H, W, C)

    # Weights in f32 with the residual folded into the center tap.
    w = jnp.transpose(weight.reshape(C, 3, 3), (1, 2, 0)).astype(jnp.float32)  # (3, 3, C)
    w = w.at[1, 1, :].add(1.0)
    b = bias.reshape(1, C).astype(jnp.float32)                                 # (1, C)

    # VMEM budget: double-buffered in/out blocks + halo scratch + f32 plane temps.
    itemsize = x.dtype.itemsize
    blk = H * W * C * itemsize
    scratch = (H + 2) * (W + 2) * C * itemsize
    plane_tmps = 3 * (H + 2) * W * C * 4 + H * W * C * 4
    vmem_need = 2 * 2 * blk + scratch + plane_tmps + 2 * (9 + 1) * C * 4

    # Per-generation cap: ~3/4 of physical VMEM (128 MiB on v5e/v6e, 64 MiB on v7x).
    try:
        phys_vmem = int(pltpu.get_tpu_info().vmem_capacity_bytes)
    except Exception:
        phys_vmem = 64 << 20
    vmem_limit = int(min(max(int(1.5 * vmem_need), 8 << 20), (phys_vmem * 3) // 4))

    out_nhwc = pl.pallas_call(
        _adaptive_fm_kernel,
        out_shape=jax.ShapeDtypeStruct((N, H, W, C), x.dtype),
        grid_spec=pltpu.PrefetchScalarGridSpec(
            num_scalar_prefetch=0,
            grid=(N,),
            in_specs=[
                pl.BlockSpec((1, H, W, C), lambda n: (n, 0, 0, 0)),
                # Constant block index -> fetched once, not per grid step.
                pl.BlockSpec((3, 3, C), lambda n: (0, 0, 0)),
                pl.BlockSpec((1, C), lambda n: (0, 0)),
            ],
            out_specs=pl.BlockSpec((1, H, W, C), lambda n: (n, 0, 0, 0)),
            scratch_shapes=[pltpu.VMEM((H + 2, W + 2, C), x.dtype)],
        ),
        compiler_params=pltpu.CompilerParams(
            dimension_semantics=("parallel",),
            vmem_limit_bytes=vmem_limit,
        ),
    )(x_nhwc, w, b)

    return jnp.transpose(out_nhwc, (0, 3, 1, 2))                              # back to NCHW


def _reference(x, weight, bias):
    # Depthwise conv (groups=C), padding=1, NCHW — same as nn.Conv2d(..., groups=C) + x.
    C = x.shape[1]
    out = lax.conv_general_dilated(
        x, weight,
        window_strides=(1, 1),
        padding=((1, 1), (1, 1)),
        dimension_numbers=("NCHW", "OIHW", "NCHW"),
        feature_group_count=C,
    )
    return out + bias.reshape(1, C, 1, 1) + x


if __name__ == "__main__":
    key = jax.random.PRNGKey(0)
    kx, kw, kb = jax.random.split(key, 3)

    N, C, H, W = 2, 4, 16, 16
    x = jax.random.normal(kx, (N, C, H, W), dtype=jnp.float32)

    # Deterministic parameter init (PyTorch-like uniform bound = 1/sqrt(fan_in)).
    fan_in = 1 * 3 * 3
    bound = 1.0 / (fan_in ** 0.5)
    weight = jax.random.uniform(kw, (C, 1, 3, 3), jnp.float32, -bound, bound)
    bias = jax.random.uniform(kb, (C,), jnp.float32, -bound, bound)

    out = adaptive_fm(x, weight, bias)
    out = jax.block_until_ready(out)

    ref = _reference(x, weight, bias)
    assert out.shape == ref.shape
    assert jnp.allclose(out, ref, atol=1e-5, rtol=1e-5), "mismatch vs reference"

    print("KERNEL_OK")
</pallas_src>

<mosaic_0001>
module attributes {stable_mosaic.version = 11 : i64} {
  func.func @_adaptive_fm_kernel(%arg0: i32, %arg1: memref<1x16x16x4xf32, #tpu.memory_space<vmem>>, %arg2: memref<3x3x4xf32, #tpu.memory_space<vmem>>, %arg3: memref<1x4xf32, #tpu.memory_space<vmem>>, %arg4: memref<1x16x16x4xf32, #tpu.memory_space<vmem>>, %arg5: memref<18x18x4xf32, #tpu.memory_space<vmem>>) attributes {dimension_semantics = [#tpu.dimension_semantics<parallel>], iteration_bounds = array<i64: 2>, scalar_prefetch = 0 : i64, scratch_operands = 1 : i64, tpu.core_type = #tpu.core_type<tc>, window_params = [{transform_indices = @transform_0, window_bounds = array<i64: 1, 16, 16, 4>}, {pipeline_mode = #tpu.pipeline_mode<synchronous>, transform_indices = @transform_1, window_bounds = array<i64: 3, 3, 4>}, {pipeline_mode = #tpu.pipeline_mode<synchronous>, transform_indices = @transform_2, window_bounds = array<i64: 1, 4>}, {transform_indices = @transform_3, window_bounds = array<i64: 1, 16, 16, 4>}]} {
    %cst = arith.constant 0.000000e+00 : f32
    %0 = vector.broadcast %cst : f32 to vector<1x18x4xf32>
    %c0 = arith.constant 0 : index
    %c0_0 = arith.constant 0 : index
    %c0_1 = arith.constant 0 : index
    %1 = vector.load %arg5[%c0, %c0_0, %c0_1] : memref<18x18x4xf32, #tpu.memory_space<vmem>>, vector<1x18x4xf32>
    tpu.vector_store %arg5[%c0, %c0_0, %c0_1], %0 {strides = array<i32>} : memref<18x18x4xf32, #tpu.memory_space<vmem>>, vector<1x18x4xf32>,
    %c17 = arith.constant 17 : index
    %c0_2 = arith.constant 0 : index
    %c0_3 = arith.constant 0 : index
    %2 = vector.load %arg5[%c17, %c0_2, %c0_3] : memref<18x18x4xf32, #tpu.memory_space<vmem>>, vector<1x18x4xf32>
    tpu.vector_store %arg5[%c17, %c0_2, %c0_3], %0 {strides = array<i32>} : memref<18x18x4xf32, #tpu.memory_space<vmem>>, vector<1x18x4xf32>,
    %cst_4 = arith.constant 0.000000e+00 : f32
    %3 = vector.broadcast %cst_4 : f32 to vector<18x1x4xf32>
    %c0_5 = arith.constant 0 : index
    %c0_6 = arith.constant 0 : index
    %c0_7 = arith.constant 0 : index
    %4 = vector.load %arg5[%c0_5, %c0_6, %c0_7] : memref<18x18x4xf32, #tpu.memory_space<vmem>>, vector<18x1x4xf32>
    tpu.vector_store %arg5[%c0_5, %c0_6, %c0_7], %3 {strides = array<i32>} : memref<18x18x4xf32, #tpu.memory_space<vmem>>, vector<18x1x4xf32>,
    %c0_8 = arith.constant 0 : index
    %c17_9 = arith.constant 17 : index
    %c0_10 = arith.constant 0 : index
    %5 = vector.load %arg5[%c0_8, %c17_9, %c0_10] : memref<18x18x4xf32, #tpu.memory_space<vmem>>, vector<18x1x4xf32>
    tpu.vector_store %arg5[%c0_8, %c17_9, %c0_10], %3 {strides = array<i32>} : memref<18x18x4xf32, #tpu.memory_space<vmem>>, vector<18x1x4xf32>,
    %c0_11 = arith.constant 0 : index
    %c0_12 = arith.constant 0 : index
    %c0_13 = arith.constant 0 : index
    %c0_14 = arith.constant 0 : index
    %6 = vector.load %arg1[%c0_11, %c0_12, %c0_13, %c0_14] : memref<1x16x16x4xf32, #tpu.memory_space<vmem>>, vector<1x16x16x4xf32>
    %7 = vector.shape_cast %6 : vector<1x16x16x4xf32> to vector<16x16x4xf32>
    %c1 = arith.constant 1 : index
    %c1_15 = arith.constant 1 : index
    %c0_16 = arith.constant 0 : index
    %8 = vector.load %arg5[%c1, %c1_15, %c0_16] : memref<18x18x4xf32, #tpu.memory_space<vmem>>, vector<16x16x4xf32>
    tpu.vector_store %arg5[%c1, %c1_15, %c0_16], %7 {strides = array<i32>} : memref<18x18x4xf32, #tpu.memory_space<vmem>>, vector<16x16x4xf32>,
    %c0_17 = arith.constant 0 : index
    %c0_18 = arith.constant 0 : index
    %c0_19 = arith.constant 0 : index
    %9 = vector.load %arg2[%c0_17, %c0_18, %c0_19] : memref<3x3x4xf32, #tpu.memory_space<vmem>>, vector<3x3x4xf32>
    %c0_20 = arith.constant 0 : index
    %c0_21 = arith.constant 0 : index
    %10 = vector.load %arg3[%c0_20, %c0_21] : memref<1x4xf32, #tpu.memory_space<vmem>>, vector<1x4xf32>
    %11 = vector.shape_cast %10 : vector<1x4xf32> to vector<1x1x4xf32>
    %12 = vector.shape_cast %11 : vector<1x1x4xf32> to vector<1x1x4xf32>
    %13 = vector.broadcast %12 : vector<1x1x4xf32> to vector<16x16x4xf32>
    %c0_22 = arith.constant 0 : index
    %c0_23 = arith.constant 0 : index
    %c0_24 = arith.constant 0 : index
    %14 = vector.load %arg5[%c0_22, %c0_23, %c0_24] : memref<18x18x4xf32, #tpu.memory_space<vmem>>, vector<18x16x4xf32>
    %15 = vector.extract_strided_slice %14 {offsets = [0, 0, 0], sizes = [16, 16, 4], strides = [1, 1, 1]} : vector<18x16x4xf32> to vector<16x16x4xf32>
    %16 = vector.extract_strided_slice %9 {offsets = [0, 0, 0], sizes = [1, 1, 4], strides = [1, 1, 1]} : vector<3x3x4xf32> to vector<1x1x4xf32>
    %17 = vector.shape_cast %16 : vector<1x1x4xf32> to vector<4xf32>
    %18 = vector.shape_cast %17 : vector<4xf32> to vector<1x1x4xf32>
    %19 = vector.broadcast %18 : vector<1x1x4xf32> to vector<16x16x4xf32>
    %20 = arith.mulf %15, %19 : vector<16x16x4xf32>
    %21 = arith.addf %13, %20 : vector<16x16x4xf32>
    %22 = vector.extract_strided_slice %14 {offsets = [1, 0, 0], sizes = [16, 16, 4], strides = [1, 1, 1]} : vector<18x16x4xf32> to vector<16x16x4xf32>
    %23 = vector.extract_strided_slice %9 {offsets = [1, 0, 0], sizes = [1, 1, 4], strides = [1, 1, 1]} : vector<3x3x4xf32> to vector<1x1x4xf32>
    %24 = vector.shape_cast %23 : vector<1x1x4xf32> to vector<4xf32>
    %25 = vector.shape_cast %24 : vector<4xf32> to vector<1x1x4xf32>
    %26 = vector.broadcast %25 : vector<1x1x4xf32> to vector<16x16x4xf32>
    %27 = arith.mulf %22, %26 : vector<16x16x4xf32>
    %28 = arith.addf %21, %27 : vector<16x16x4xf32>
    %29 = vector.extract_strided_slice %14 {offsets = [2, 0, 0], sizes = [16, 16, 4], strides = [1, 1, 1]} : vector<18x16x4xf32> to vector<16x16x4xf32>
    %30 = vector.extract_strided_slice %9 {offsets = [2, 0, 0], sizes = [1, 1, 4], strides = [1, 1, 1]} : vector<3x3x4xf32> to vector<1x1x4xf32>
    %31 = vector.shape_cast %30 : vector<1x1x4xf32> to vector<4xf32>
    %32 = vector.shape_cast %31 : vector<4xf32> to vector<1x1x4xf32>
    %33 = vector.broadcast %32 : vector<1x1x4xf32> to vector<16x16x4xf32>
    %34 = arith.mulf %29, %33 : vector<16x16x4xf32>
    %35 = arith.addf %28, %34 : vector<16x16x4xf32>
    %c0_25 = arith.constant 0 : index
    %c1_26 = arith.constant 1 : index
    %c0_27 = arith.constant 0 : index
    %36 = vector.load %arg5[%c0_25, %c1_26, %c0_27] : memref<18x18x4xf32, #tpu.memory_space<vmem>>, vector<18x16x4xf32>
    %37 = vector.extract_strided_slice %36 {offsets = [0, 0, 0], sizes = [16, 16, 4], strides = [1, 1, 1]} : vector<18x16x4xf32> to vector<16x16x4xf32>
    %38 = vector.extract_strided_slice %9 {offsets = [0, 1, 0], sizes = [1, 1, 4], strides = [1, 1, 1]} : vector<3x3x4xf32> to vector<1x1x4xf32>
    %39 = vector.shape_cast %38 : vector<1x1x4xf32> to vector<4xf32>
    %40 = vector.shape_cast %39 : vector<4xf32> to vector<1x1x4xf32>
    %41 = vector.broadcast %40 : vector<1x1x4xf32> to vector<16x16x4xf32>
    %42 = arith.mulf %37, %41 : vector<16x16x4xf32>
    %43 = arith.addf %35, %42 : vector<16x16x4xf32>
    %44 = vector.extract_strided_slice %36 {offsets = [1, 0, 0], sizes = [16, 16, 4], strides = [1, 1, 1]} : vector<18x16x4xf32> to vector<16x16x4xf32>
    %45 = vector.extract_strided_slice %9 {offsets = [1, 1, 0], sizes = [1, 1, 4], strides = [1, 1, 1]} : vector<3x3x4xf32> to vector<1x1x4xf32>
    %46 = vector.shape_cast %45 : vector<1x1x4xf32> to vector<4xf32>
    %47 = vector.shape_cast %46 : vector<4xf32> to vector<1x1x4xf32>
    %48 = vector.broadcast %47 : vector<1x1x4xf32> to vector<16x16x4xf32>
    %49 = arith.mulf %44, %48 : vector<16x16x4xf32>
    %50 = arith.addf %43, %49 : vector<16x16x4xf32>
    %51 = vector.extract_strided_slice %36 {offsets = [2, 0, 0], sizes = [16, 16, 4], strides = [1, 1, 1]} : vector<18x16x4xf32> to vector<16x16x4xf32>
    %52 = vector.extract_strided_slice %9 {offsets = [2, 1, 0], sizes = [1, 1, 4], strides = [1, 1, 1]} : vector<3x3x4xf32> to vector<1x1x4xf32>
    %53 = vector.shape_cast %52 : vector<1x1x4xf32> to vector<4xf32>
    %54 = vector.shape_cast %53 : vector<4xf32> to vector<1x1x4xf32>
    %55 = vector.broadcast %54 : vector<1x1x4xf32> to vector<16x16x4xf32>
    %56 = arith.mulf %51, %55 : vector<16x16x4xf32>
    %57 = arith.addf %50, %56 : vector<16x16x4xf32>
    %c0_28 = arith.constant 0 : index
    %c2 = arith.constant 2 : index
    %c0_29 = arith.constant 0 : index
    %58 = vector.load %arg5[%c0_28, %c2, %c0_29] : memref<18x18x4xf32, #tpu.memory_space<vmem>>, vector<18x16x4xf32>
    %59 = vector.extract_strided_slice %58 {offsets = [0, 0, 0], sizes = [16, 16, 4], strides = [1, 1, 1]} : vector<18x16x4xf32> to vector<16x16x4xf32>
    %60 = vector.extract_strided_slice %9 {offsets = [0, 2, 0], sizes = [1, 1, 4], strides = [1, 1, 1]} : vector<3x3x4xf32> to vector<1x1x4xf32>
    %61 = vector.shape_cast %60 : vector<1x1x4xf32> to vector<4xf32>
    %62 = vector.shape_cast %61 : vector<4xf32> to vector<1x1x4xf32>
    %63 = vector.broadcast %62 : vector<1x1x4xf32> to vector<16x16x4xf32>
    %64 = arith.mulf %59, %63 : vector<16x16x4xf32>
    %65 = arith.addf %57, %64 : vector<16x16x4xf32>
    %66 = vector.extract_strided_slice %58 {offsets = [1, 0, 0], sizes = [16, 16, 4], strides = [1, 1, 1]} : vector<18x16x4xf32> to vector<16x16x4xf32>
    %67 = vector.extract_strided_slice %9 {offsets = [1, 2, 0], sizes = [1, 1, 4], strides = [1, 1, 1]} : vector<3x3x4xf32> to vector<1x1x4xf32>
    %68 = vector.shape_cast %67 : vector<1x1x4xf32> to vector<4xf32>
    %69 = vector.shape_cast %68 : vector<4xf32> to vector<1x1x4xf32>
    %70 = vector.broadcast %69 : vector<1x1x4xf32> to vector<16x16x4xf32>
    %71 = arith.mulf %66, %70 : vector<16x16x4xf32>
    %72 = arith.addf %65, %71 : vector<16x16x4xf32>
    %73 = vector.extract_strided_slice %58 {offsets = [2, 0, 0], sizes = [16, 16, 4], strides = [1, 1, 1]} : vector<18x16x4xf32> to vector<16x16x4xf32>
    %74 = vector.extract_strided_slice %9 {offsets = [2, 2, 0], sizes = [1, 1, 4], strides = [1, 1, 1]} : vector<3x3x4xf32> to vector<1x1x4xf32>
    %75 = vector.shape_cast %74 : vector<1x1x4xf32> to vector<4xf32>
    %76 = vector.shape_cast %75 : vector<4xf32> to vector<1x1x4xf32>
    %77 = vector.broadcast %76 : vector<1x1x4xf32> to vector<16x16x4xf32>
    %78 = arith.mulf %73, %77 : vector<16x16x4xf32>
    %79 = arith.addf %72, %78 : vector<16x16x4xf32>
    %c0_30 = arith.constant 0 : index
    %c0_31 = arith.constant 0 : index
    %c0_32 = arith.constant 0 : index
    %c0_33 = arith.constant 0 : index
    %80 = vector.load %arg4[%c0_30, %c0_31, %c0_32, %c0_33] : memref<1x16x16x4xf32, #tpu.memory_space<vmem>>, vector<1x16x16x4xf32>
    %81 = vector.shape_cast %80 : vector<1x16x16x4xf32> to vector<16x16x4xf32>
    %82 = vector.shape_cast %79 : vector<16x16x4xf32> to vector<1x16x16x4xf32>
    tpu.vector_store %arg4[%c0_30, %c0_31, %c0_32, %c0_33], %82 {strides = array<i32>} : memref<1x16x16x4xf32, #tpu.memory_space<vmem>>, vector<1x16x16x4xf32>,
    return
  }
  func.func @transform_0(%arg0: i32) -> (i32, i32, i32, i32) {
    %c0_i32 = arith.constant 0 : i32
    %c0_i32_0 = arith.constant 0 : i32
    %c0_i32_1 = arith.constant 0 : i32
    %c0_i32_2 = arith.constant 0 : i32
    return %arg0, %c0_i32, %c0_i32_0, %c0_i32_1 : i32, i32, i32, i32
  }
  func.func @transform_1(%arg0: i32) -> (i32, i32, i32) {
    %c0_i32 = arith.constant 0 : i32
    %c0_i32_0 = arith.constant 0 : i32
    %c0_i32_1 = arith.constant 0 : i32
    %c0_i32_2 = arith.constant 0 : i32
    return %c0_i32, %c0_i32_0, %c0_i32_1 : i32, i32, i32
  }
  func.func @transform_2(%arg0: i32) -> (i32, i32) {
    %c0_i32 = arith.constant 0 : i32
    %c0_i32_0 = arith.constant 0 : i32
    %c0_i32_1 = arith.constant 0 : i32
    return %c0_i32, %c0_i32_0 : i32, i32
  }
  func.func @transform_3(%arg0: i32) -> (i32, i32, i32, i32) {
    %c0_i32 = arith.constant 0 : i32
    %c0_i32_0 = arith.constant 0 : i32
    %c0_i32_1 = arith.constant 0 : i32
    %c0_i32_2 = arith.constant 0 : i32
    return %arg0, %c0_i32, %c0_i32_0, %c0_i32_1 : i32, i32, i32, i32
  }
}

</mosaic_0001>

<bundles_post_ra>
// kernel: tpu_custom_call.1
= control target key start
LH: loop header
LB: loop body
LE: loop exit
PB: predicated region body
PF: predicated region fallthrough
CT: control target
= control target key end

     0   :  { %s1122_s12 = smov 0   ;;  %s2119_s0 = inlined_call_operand.vmem [shape: f32[2,16,16,4], index: 0, kind: input, shape index: {}]   ;;  %s2120_s1 = inlined_call_operand.vmem [shape: f32[3,3,4], index: 1, kind: input, shape index: {}]   ;;  %s2121_s2 = inlined_call_operand.vmem [shape: f32[1,4], index: 2, kind: input, shape index: {}]   ;;  %s2122_s3 = inlined_call_operand.vmem [shape: f32[2,16,16,4], index: 3, kind: output, shape index: {}]  }
   0x1 LB: > { %s1069_s13 = sadd.s32 4294967295, %s1099_s12   ;;  %p1073_p0 = scmp.ge.s32.totalorder %s1099_s12, 1  ;;  %s1099_s12 = sphi %s1122_s12, %s13_s12  }
   0x2   : > { %p137_p1 = scmp.lt.s32.totalorder %s1099_s12, 3 }
   0x4   : > { %p138_p2 = pnand %p1073_p0, %p137_p1 }
   0x5   : > { %p161_p3 = scmp.lt.s32.totalorder (!%p138_p2), %s1069_s13, 1 }
   0x6   : > { %141 = sbr.rel (%p138_p2) target bundleno = 215 (0xd7), region = 32 }
   0xb   : > { %vm171_vm0 = vcmask 31744   ;;  %v1101_v0 = vmov 0.0   ;;  %vm180_vm1 = vcmask 24576   ;;  %s2124_s13 = smov (!%p161_p3, %s1069_s13), 1  ;;  %vm174_vm2 = vcmask 25600  }
   0xc   : > { %172 = vst.msk [vmem:[#allocation2] sm:$0xff] %vm171_vm0, %v1101_v0  ;;  %s1080_s14 = sshll.u32 %s2124_s13, 8  ;;  %v282_v4 = vld [vmem:[%s2120_s1] sm:$0x7]  ;;  %v283_v8 = vld [vmem:[%s2120_s1 + $0x4] sm:$0x7] }
   0xd   : > { %173 = vst.msk [vmem:[#allocation2 + $0x8] sm:$0xff] %vm171_vm0, %v1101_v0  ;;  %s1179_s17 = scalar_lea.vmem %s2119_s0, %s1080_s14  ;;  %v1197_v9 = vperm.slane %v282_v4, 0  ;;  %v1204_v11 = vld [vmem:[%s2121_s2] ss:$0 sm:$0xff]  ;;  %v284_v13 = vld [vmem:[%s2120_s1 + $0x8] sm:$0x7]  ;;  %s1410_s28 = scalar_lea.vmem %s2122_s3, %s1080_s14 }
   0xe   : > { %177 = vst.msk [vmem:[#allocation2 + $0x198] sm:$0xff] %vm171_vm0, %v1101_v0  ;;  %v217_v1 = vld [vmem:[%s1179_s17] sm:$0xff]  ;;  %v218_v2 = vld [vmem:[%s1179_s17 + $0x8] sm:$0xff]  ;;  %v219_v3 = vld [vmem:[%s1179_s17 + $0x10] sm:$0xff]  ;;  %v1214_v17 = vperm.slane %v283_v8, 0  ;;  %v1224_v24 = vperm.slane %v284_v13, 0 }
   0xf   : > { %178 = vst.msk [vmem:[#allocation2 + $0x1a0] sm:$0xff] %vm171_vm0, %v1101_v0  ;;  %v220_v5 = vld [vmem:[%s1179_s17 + $0x18] sm:$0xff]  ;;  %v221_v7 = vld [vmem:[%s1179_s17 + $0x20] sm:$0xff]  ;;  %v222_v10 = vld [vmem:[%s1179_s17 + $0x28] sm:$0xff]  ;;  %v1226_v25 = vperm.slane %v282_v4, 1  ;;  %v1230_v29 = vperm.slane %v282_v4, 2 }
  0x10   : > { %181 = vst.msk [vmem:[#allocation2] sm:$0x1] %vm180_vm1, %v1101_v0  ;;  %v223_v12 = vld [vmem:[%s1179_s17 + $0x30] sm:$0xff]  ;;  %v224_v16 = vld [vmem:[%s1179_s17 + $0x38] sm:$0xff]  ;;  %v225_v19 = vld [vmem:[%s1179_s17 + $0x40] sm:$0xff]  ;;  %v1240_v38 = vperm.slane %v283_v8, 1 }
  0x11   : > { %182 = vst.msk [vmem:[#allocation2 + $0x18] sm:$0x1] %vm180_vm1, %v1101_v0  ;;  %v226_v20 = vld [vmem:[%s1179_s17 + $0x48] sm:$0xff]  ;;  %v227_v21 = vld [vmem:[%s1179_s17 + $0x50] sm:$0xff]  ;;  %v228_v22 = vld [vmem:[%s1179_s17 + $0x58] sm:$0xff]  ;;  %v1242_v39 = vperm.slane %v284_v13, 1 }
  0x12   : > { %183 = vst.msk [vmem:[#allocation2 + $0x30] sm:$0x1] %vm180_vm1, %v1101_v0  ;;  %v229_v26 = vld [vmem:[%s1179_s17 + $0x60] sm:$0xff]  ;;  %v230_v31 = vld [vmem:[%s1179_s17 + $0x68] sm:$0xff]  ;;  %v1244_v40 = vperm.slane %v283_v8, 2  ;;  %v1251_v48 = vperm.slane %v284_v13, 2 }
  0x13   : > { %184 = vst.msk [vmem:[#allocation2 + $0x48] sm:$0x1] %vm180_vm1, %v1101_v0  ;;  %v231_v50 = vld [vmem:[%s1179_s17 + $0x70] sm:$0xff]  ;;  %v232_v57 = vld [vmem:[%s1179_s17 + $0x78] sm:$0xff]  ;;  %v233_v63 = vld [vmem:[%s1179_s17 + $0x80] sm:$0xff] }
  0x14   : > { %185 = vst.msk [vmem:[#allocation2 + $0x60] sm:$0x1] %vm180_vm1, %v1101_v0  ;;  %v290_v15 = vld [vmem:[#allocation2 + $0x8] sm:$0xff] }
  0x15   : > { %186 = vst.msk [vmem:[#allocation2 + $0x78] sm:$0x1] %vm180_vm1, %v1101_v0  ;;  %v327_v18 = vmul.f32 %v1197_v9, %v290_v15  ;;  %v520_v28 = vld [vmem:[#allocation2 + $0x1] sm:$0xff] }
  0x16   : > { %187 = vst.msk [vmem:[#allocation2 + $0x90] sm:$0x1] %vm180_vm1, %v1101_v0  ;;  %v751_v33 = vld [vmem:[#allocation2 + $0x2] sm:$0xff]  ;;  %v557_v46 = vmul.f32 %v1226_v25, %v520_v28 }
  0x17   : > { %188 = vst.msk [vmem:[#allocation2 + $0xa8] sm:$0x1] %vm180_vm1, %v1101_v0  ;;  %v289_v6 = vld [vmem:[#allocation2] sm:$0xff]  ;;  %v359_v30 = vadd.f32 %v1204_v11, %v327_v18  ;;  %v1258_v51 = vmul.f32 %v1230_v29, %v751_v33 }
  0x18   : > { %189 = vst.msk [vmem:[#allocation2 + $0xc0] sm:$0x1] %vm180_vm1, %v1101_v0  ;;  %v326_v14 = vmul.f32 %v1197_v9, %v289_v6  ;;  %v234_v6 = vld [vmem:[%s1179_s17 + $0x88] sm:$0xff] }
  0x19   : > { %190 = vst.msk [vmem:[#allocation2 + $0xd8] sm:$0x1] %vm180_vm1, %v1101_v0 }
  0x1a   : > { %191 = vst.msk [vmem:[#allocation2 + $0xf0] sm:$0x1] %vm180_vm1, %v1101_v0  ;;  %v358_v23 = vadd.f32 %v1204_v11, %v326_v14  ;;  %v235_v14 = vld [vmem:[%s1179_s17 + $0x90] sm:$0xff] }
  0x1b   : > { %192 = vst.msk [vmem:[#allocation2 + $0x108] sm:$0x1] %vm180_vm1, %v1101_v0 }
  0x1c   : > { %193 = vst.msk [vmem:[#allocation2 + $0x120] sm:$0x1] %vm180_vm1, %v1101_v0 }
  0x1d   : > { %194 = vst.msk [vmem:[#allocation2 + $0x138] sm:$0x1] %vm180_vm1, %v1101_v0 }
  0x1e   : > { %195 = vst.msk [vmem:[#allocation2 + $0x150] sm:$0x1] %vm180_vm1, %v1101_v0 }
  0x1f   : > { %196 = vst.msk [vmem:[#allocation2 + $0x168] sm:$0x1] %vm180_vm1, %v1101_v0 }
  0x20   : > { %197 = vst.msk [vmem:[#allocation2 + $0x180] sm:$0x1] %vm180_vm1, %v1101_v0 }
  0x21   : > { %198 = vst.msk [vmem:[#allocation2 + $0x198] sm:$0x1] %vm180_vm1, %v1101_v0 }
  0x22   : > { %200 = vst.msk [vmem:[#allocation2 + $0x29] sm:$0x1] %vm180_vm1, %v1101_v0 }
  0x23   : > { %201 = vst.msk [vmem:[#allocation2 + $0x41] sm:$0x1] %vm180_vm1, %v1101_v0 }
  0x24   : > { %202 = vst.msk [vmem:[#allocation2 + $0x59] sm:$0x1] %vm180_vm1, %v1101_v0 }
  0x25   : > { %203 = vst.msk [vmem:[#allocation2 + $0x71] sm:$0x1] %vm180_vm1, %v1101_v0 }
  0x26   : > { %204 = vst.msk [vmem:[#allocation2 + $0x89] sm:$0x1] %vm180_vm1, %v1101_v0 }
  0x27   : > { %205 = vst.msk [vmem:[#allocation2 + $0xa1] sm:$0x1] %vm180_vm1, %v1101_v0 }
  0x28   : > { %206 = vst.msk [vmem:[#allocation2 + $0xb9] sm:$0x1] %vm180_vm1, %v1101_v0 }
  0x29   : > { %207 = vst.msk [vmem:[#allocation2 + $0xd1] sm:$0x1] %vm180_vm1, %v1101_v0 }
  0x2a   : > { %208 = vst.msk [vmem:[#allocation2 + $0xe9] sm:$0x1] %vm180_vm1, %v1101_v0 }
  0x2b   : > { %209 = vst.msk [vmem:[#allocation2 + $0x101] sm:$0x1] %vm180_vm1, %v1101_v0 }
  0x2c   : > { %210 = vst.msk [vmem:[#allocation2 + $0x119] sm:$0x1] %vm180_vm1, %v1101_v0 }
  0x2d   : > { %211 = vst.msk [vmem:[#allocation2 + $0x131] sm:$0x1] %vm180_vm1, %v1101_v0 }
  0x2e   : > { %212 = vst.msk [vmem:[#allocation2 + $0x149] sm:$0x1] %vm180_vm1, %v1101_v0 }
  0x2f   : > { %213 = vst.msk [vmem:[#allocation2 + $0x161] sm:$0x1] %vm180_vm1, %v1101_v0 }
  0x30   : > { %214 = vst.msk [vmem:[#allocation2 + $0x179] sm:$0x1] %vm180_vm1, %v1101_v0 }
  0x31   : > { %215 = vst.msk [vmem:[#allocation2 + $0x191] sm:$0x1] %vm180_vm1, %v1101_v0 }
  0x32   : > { %175 = vst.msk [vmem:[#allocation2 + $0x10] sm:$0x3] %vm174_vm2, %v1101_v0 }
  0x33   : > { %179 = vst.msk [vmem:[#allocation2 + $0x1a8] sm:$0x3] %vm174_vm2, %v1101_v0 }
  0x34   : > { %199 = vst.msk [vmem:[#allocation2 + $0x11] sm:$0x1] %vm180_vm1, %v1101_v0 }
  0x35   : > { %216 = vst.msk [vmem:[#allocation2 + $0x1a9] sm:$0x1] %vm180_vm1, %v1101_v0 }
  0x36   : > { %250 = vst.msk [vmem:[#allocation2 + $0x19] sm:$0xff] %vm171_vm0, %v217_v1 }
  0x37   : > { %251 = vst.msk [vmem:[#allocation2 + $0x21] sm:$0xff] %vm171_vm0, %v218_v2 }
  0x38   : > { %252 = vst.msk [vmem:[#allocation2 + $0x31] sm:$0xff] %vm171_vm0, %v219_v3 }
  0x39   : > { %253 = vst.msk [vmem:[#allocation2 + $0x39] sm:$0xff] %vm171_vm0, %v220_v5  ;;  %v521_v35 = vld [vmem:[#allocation2 + $0x9] sm:$0xff] }
  0x3a   : > { %254 = vst.msk [vmem:[#allocation2 + $0x49] sm:$0xff] %vm171_vm0, %v221_v7  ;;  %v558_v55 = vmul.f32 %v1226_v25, %v521_v35 }
  0x3b   : > { %255 = vst.msk [vmem:[#allocation2 + $0x51] sm:$0xff] %vm171_vm0, %v222_v10  ;;  %v752_v42 = vld [vmem:[#allocation2 + $0xa] sm:$0xff] }
  0x3c   : > { %256 = vst.msk [vmem:[#allocation2 + $0x61] sm:$0xff] %vm171_vm0, %v223_v12  ;;  %v789_v60 = vmul.f32 %v1230_v29, %v752_v42 }
  0x3d   : > { %257 = vst.msk [vmem:[#allocation2 + $0x69] sm:$0xff] %vm171_vm0, %v224_v16  ;;  %v291_v27 = vld [vmem:[#allocation2 + $0x18] sm:$0xff] }
  0x3e   : > { %258 = vst.msk [vmem:[#allocation2 + $0x79] sm:$0xff] %vm171_vm0, %v225_v19  ;;  %v391_v32 = vmul.f32 %v1214_v17, %v291_v27  ;;  %v292_v34 = vld [vmem:[#allocation2 + $0x20] sm:$0xff]  ;;  %v328_v36 = vmul.f32 %v1197_v9, %v291_v27 }
  0x3f   : > { %259 = vst.msk [vmem:[#allocation2 + $0x81] sm:$0xff] %vm171_vm0, %v226_v20  ;;  %v1238_v37 = vld [vmem:[#allocation2 + $0x30] sm:$0xff]  ;;  %v392_v41 = vmul.f32 %v1214_v17, %v292_v34  ;;  %v522_v45 = vld [vmem:[#allocation2 + $0x19] sm:$0xff]  ;;  %v1262_v54 = vld [vmem:[#allocation2 + $0x21] sm:$0xff]  ;;  %v329_v20 = vmul.f32 %v1197_v9, %v292_v34 }
  0x40   : > { %260 = vst.msk [vmem:[#allocation2 + $0x91] sm:$0xff] %vm171_vm0, %v227_v21  ;;  %v423_v43 = vadd.f32 %v391_v32, %v358_v23  ;;  %v456_v44 = vmul.f32 %v1224_v24, %v1238_v37  ;;  %v753_v47 = vld [vmem:[#allocation2 + $0x1a] sm:$0xff]  ;;  %v1269_v59 = vld [vmem:[#allocation2 + $0x31] sm:$0xff]  ;;  %v360_v61 = vadd.f32 %v1204_v11, %v328_v36  ;;  %v393_v62 = vmul.f32 %v1214_v17, %v1238_v37  ;;  %v1283_v4 = vld [vmem:[#allocation2 + $0x22] sm:$0xff] }
  0x41   : > { %v1253_v49 = vld [vmem:[#allocation2 + $0x38] sm:$0xff]  ;;  %261 = vst.msk [vmem:[#allocation2 + $0x99] sm:$0xff] %vm171_vm0, %v228_v22  ;;  %v424_v52 = vadd.f32 %v392_v41, %v359_v30  ;;  %v1265_v56 = vld [vmem:[#allocation2 + $0x48] sm:$0xff]  ;;  %v622_v0 = vmul.f32 %v1240_v38, %v522_v45  ;;  %v1281_v2 = vmul.f32 %v1244_v40, %v753_v47  ;;  %v559_v5 = vmul.f32 %v1226_v25, %v522_v45  ;;  %v237_v30 = vld [vmem:[%s1179_s17 + $0xa0] sm:$0xff] }
  0x42   : > { %v457_v53 = vmul.f32 %v1224_v24, %v1253_v49  ;;  %262 = vst.msk [vmem:[#allocation2 + $0xa9] sm:$0xff] %vm171_vm0, %v229_v26  ;;  %v488_v58 = vadd.f32 %v456_v44, %v423_v43  ;;  %v1278_v1 = vld [vmem:[#allocation2 + $0x32] sm:$0xff]  ;;  %v623_v10 = vmul.f32 %v1240_v38, %v1262_v54  ;;  %v425_v12 = vadd.f32 %v393_v62, %v360_v61  ;;  %v1298_v18 = vld [vmem:[#allocation2 + $0x3a] sm:$0xff]  ;;  %v1316_v33 = vld [vmem:[#allocation2 + $0x49] sm:$0xff] }
  0x43   : > { %263 = vst.msk [vmem:[#allocation2 + $0xb1] sm:$0xff] %vm171_vm0, %v230_v31  ;;  %v1288_v8 = vld [vmem:[#allocation2 + $0x39] sm:$0xff]  ;;  %v458_v13 = vmul.f32 %v1224_v24, %v1265_v56  ;;  %v687_v15 = vmul.f32 %v1242_v39, %v1269_v59  ;;  %v790_v19 = vmul.f32 %v1230_v29, %v753_v47  ;;  %v1306_v23 = vmul.f32 %v1251_v48, %v1278_v1  ;;  %v1310_v28 = vld [vmem:[#allocation2 + $0x50] sm:$0xff]  ;;  %v238_v36 = vld [vmem:[%s1179_s17 + $0xa8] sm:$0xff] }
  0x44   : > { %v489_v3 = vadd.f32 %v457_v53, %v424_v52  ;;  %264 = vst.msk [vmem:[#allocation2 + $0xc1] sm:$0xff] %vm171_vm0, %v231_v50  ;;  %v589_v7 = vadd.f32 %v557_v46, %v488_v58  ;;  %v236_v21 = vld [vmem:[%s1179_s17 + $0x98] sm:$0xff]  ;;  %v854_v26 = vmul.f32 %v1244_v40, %v1283_v4  ;;  %v688_v32 = vmul.f32 %v1242_v39, %v1288_v8  ;;  %v239_v45 = vld [vmem:[%s1179_s17 + $0xb0] sm:$0xff] }
  0x45   : > { %265 = vst.msk [vmem:[#allocation2 + $0xc9] sm:$0xff] %vm171_vm0, %v232_v57  ;;  %v490_v27 = vadd.f32 %v458_v13, %v425_v12  ;;  %v361_v34 = vadd.f32 %v1204_v11, %v329_v20  ;;  %v394_v35 = vmul.f32 %v1214_v17, %v1253_v49  ;;  %v1325_v42 = vmul.f32 %v1251_v48, %v1298_v18  ;;  %v1331_v47 = vld [vmem:[#allocation2 + $0x4a] sm:$0xff] }
  0x46   : > { %v590_v16 = vadd.f32 %v558_v55, %v489_v3  ;;  %266 = vst.msk [vmem:[#allocation2 + $0xd9] sm:$0xff] %vm171_vm0, %v233_v63  ;;  %v654_v22 = vadd.f32 %v622_v0, %v589_v7  ;;  %v624_v44 = vmul.f32 %v1240_v38, %v1269_v59  ;;  %v459_v52 = vmul.f32 %v1224_v24, %v1310_v28  ;;  %v240_v55 = vld [vmem:[%s1179_s17 + $0xb8] sm:$0xff]  ;;  %v1346_v0 = vld [vmem:[#allocation2 + $0x60] sm:$0xff]  ;;  %v242_v7 = vld [vmem:[%s1179_s17 + $0xc8] sm:$0xff] }
  0x47   : > { %267 = vst.msk [vmem:[#allocation2 + $0xe1] sm:$0xff] %vm171_vm0, %v234_v6  ;;  %v591_v43 = vadd.f32 %v559_v5, %v490_v27  ;;  %v426_v50 = vadd.f32 %v394_v35, %v361_v34  ;;  %v330_v53 = vmul.f32 %v1197_v9, %v1238_v37  ;;  %v689_v61 = vmul.f32 %v1242_v39, %v1316_v33  ;;  %v1342_v62 = vld [vmem:[#allocation2 + $0x51] sm:$0xff]  ;;  %v241_v37 = vld [vmem:[%s1179_s17 + $0xc0] sm:$0xff] }
  0x48   : > { %v655_v31 = vadd.f32 %v623_v10, %v590_v16  ;;  %268 = vst.msk [vmem:[#allocation2 + $0xf1] sm:$0xff] %vm171_vm0, %v235_v14  ;;  %v719_v41 = vadd.f32 %v687_v15, %v654_v22  ;;  %v560_v63 = vmul.f32 %v1226_v25, %v1262_v54  ;;  %v395_v6 = vmul.f32 %v1214_v17, %v1265_v56  ;;  %v243_v13 = vld [vmem:[%s1179_s17 + $0xd0] sm:$0xff]  ;;  %v245_v34 = vld [vmem:[%s1179_s17 + $0xe0] sm:$0xff] }
  0x49   : > { %269 = vst.msk [vmem:[#allocation2 + $0xf9] sm:$0xff] %vm171_vm0, %v236_v21  ;;  %v656_v58 = vadd.f32 %v624_v44, %v591_v43  ;;  %v491_v5 = vadd.f32 %v459_v52, %v426_v50  ;;  %v855_v54 = vmul.f32 %v1244_v40, %v1278_v1  ;;  %v920_v12 = vmul.f32 %v1251_v48, %v1331_v47  ;;  %v244_v21 = vld [vmem:[%s1179_s17 + $0xd8] sm:$0xff]  ;;  %v1378_v43 = vld [vmem:[#allocation2 + $0x61] sm:$0xff] }
  0x4a   : > { %v720_v46 = vadd.f32 %v688_v32, %v655_v31  ;;  %270 = vst.msk [vmem:[#allocation2 + $0x109] sm:$0xff] %vm171_vm0, %v237_v30  ;;  %v820_v57 = vadd.f32 %v1258_v51, %v719_v41  ;;  %v362_v51 = vadd.f32 %v1204_v11, %v330_v53  ;;  %v690_v15 = vmul.f32 %v1242_v39, %v1342_v62  ;;  %v1370_v30 = vld [vmem:[#allocation2 + $0x52] sm:$0xff] }
  0x4b   : > { %271 = vst.msk [vmem:[#allocation2 + $0x111] sm:$0xff] %vm171_vm0, %v238_v36  ;;  %v721_v10 = vadd.f32 %v689_v61, %v656_v58  ;;  %v592_v14 = vadd.f32 %v560_v63, %v491_v5  ;;  %v460_v20 = vmul.f32 %v1224_v24, %v1346_v0  ;;  %v791_v31 = vmul.f32 %v1230_v29, %v1283_v4  ;;  %v246_v4 = vld [vmem:[%s1179_s17 + $0xe8] sm:$0xff] }
  0x4c   : > { %v821_v3 = vadd.f32 %v789_v60, %v720_v46  ;;  %272 = vst.msk [vmem:[#allocation2 + $0x121] sm:$0xff] %vm171_vm0, %v239_v45  ;;  %v625_v60 = vmul.f32 %v1240_v38, %v1288_v8  ;;  %v427_v16 = vadd.f32 %v395_v6, %v362_v51  ;;  %v885_v22 = vadd.f32 %v1281_v2, %v820_v57  ;;  %v247_v46 = vld [vmem:[%s1179_s17 + $0xf0] sm:$0xff] }
  0x4d   : > { %273 = vst.msk [vmem:[#allocation2 + $0x129] sm:$0xff] %vm171_vm0, %v240_v55  ;;  %v822_v27 = vadd.f32 %v790_v19, %v721_v10  ;;  %v331_v32 = vmul.f32 %v1197_v9, %v1253_v49  ;;  %v561_v2 = vmul.f32 %v1226_v25, %v1269_v59  ;;  %v1382_v19 = vld [vmem:[#allocation2 + $0x68] sm:$0xff]  ;;  %v856_v49 = vmul.f32 %v1244_v40, %v1298_v18  ;;  %v248_v55 = vld [vmem:[%s1179_s17 + $0xf8] sm:$0xff] }
  0x4e   : > { %274 = vst.msk [vmem:[#allocation2 + $0x139] sm:$0xff] %vm171_vm0, %v241_v37  ;;  %v886_v35 = vadd.f32 %v854_v26, %v821_v3  ;;  %v657_v36 = vadd.f32 %v625_v60, %v592_v14  ;;  %v492_v41 = vadd.f32 %v460_v20, %v427_v16  ;;  %v396_v45 = vmul.f32 %v1214_v17, %v1310_v28 }
  0x4f   : > { %275 = vst.msk [vmem:[#allocation2 + $0x141] sm:$0xff] %vm171_vm0, %v242_v7  ;;  %v887_v44 = vadd.f32 %v855_v54, %v822_v27  ;;  %v363_v26 = vadd.f32 %v1204_v11, %v331_v32  ;;  %v921_v59 = vmul.f32 %v1251_v48, %v1370_v30  ;;  %v626_v53 = vmul.f32 %v1240_v38, %v1316_v33  ;;  %v1420_v54 = vld [vmem:[#allocation2 + $0x78] sm:$0xff] }
  0x50   : > { %276 = vst.msk [vmem:[#allocation2 + $0x151] sm:$0xff] %vm171_vm0, %v243_v13  ;;  %v722_v50 = vadd.f32 %v690_v15, %v657_v36  ;;  %v593_v52 = vadd.f32 %v561_v2, %v492_v41  ;;  %v950_v57 = vadd.f32 %v1306_v23, %v885_v22  ;;  %v691_v58 = vmul.f32 %v1242_v39, %v1378_v43  ;;  %v1423_v13 = vld [vmem:[#allocation2 + $0x62] sm:$0xff] }
  0x51   : > { %277 = vst.msk [vmem:[#allocation2 + $0x159] sm:$0xff] %vm171_vm0, %v244_v21  ;;  %v428_v61 = vadd.f32 %v396_v45, %v363_v26  ;;  %v461_v63 = vmul.f32 %v1224_v24, %v1382_v19  ;;  %v951_v37 = vadd.f32 %v1325_v42, %v886_v35  ;;  %v332_v5 = vmul.f32 %v1197_v9, %v1265_v56  ;;  %v1425_v56 = vld [vmem:[#allocation2 + $0x69] sm:$0xff]  ;;  %v1460_v45 = vld [vmem:[#allocation2 + $0x79] sm:$0xff] }
  0x52   : > { %278 = vst.msk [vmem:[#allocation2 + $0x169] sm:$0xff] %vm171_vm0, %v245_v34  ;;  %v823_v3 = vadd.f32 %v791_v31, %v722_v50  ;;  %v658_v23 = vadd.f32 %v626_v53, %v593_v52  ;;  %v952_v51 = vadd.f32 %v920_v12, %v887_v44  ;;  %v792_v6 = vmul.f32 %v1230_v29, %v1278_v1  ;;  %v1446_v34 = vld [vmem:[#allocation2 + $0x6a] sm:$0xff]  ;;  %v1456_v44 = vld [vmem:[#allocation2 + $0x80] sm:$0xff] }
  0x53   : > { %279 = vst.msk [vmem:[#allocation2 + $0x171] sm:$0xff] %vm171_vm0, %v246_v4  ;;  %v493_v7 = vadd.f32 %v461_v63, %v428_v61  ;;  %v562_v10 = vmul.f32 %v1226_v25, %v1288_v8  ;;  %v364_v12 = vadd.f32 %v1204_v11, %v332_v5  ;;  %v397_v1 = vmul.f32 %v1214_v17, %v1346_v0  ;;  %v1483_v5 = vld [vmem:[#allocation2 + $0x7a] sm:$0xff] }
  0x54   : > { %280 = vst.msk [vmem:[#allocation2 + $0x181] sm:$0xff] %vm171_vm0, %v247_v46  ;;  %v888_v42 = vadd.f32 %v856_v49, %v823_v3  ;;  %v723_v60 = vadd.f32 %v691_v58, %v658_v23  ;;  %v857_v8 = vmul.f32 %v1244_v40, %v1331_v47  ;;  %v627_v15 = vmul.f32 %v1240_v38, %v1342_v62 }
  0x55   : > { %281 = vst.msk [vmem:[#allocation2 + $0x189] sm:$0xff] %vm171_vm0, %v248_v55  ;;  %v594_v14 = vadd.f32 %v562_v10, %v493_v7  ;;  %v429_v21 = vadd.f32 %v397_v1, %v364_v12  ;;  %v462_v22 = vmul.f32 %v1224_v24, %v1420_v54  ;;  %v922_v27 = vmul.f32 %v1251_v48, %v1423_v13 }
  0x56   : > { %982 = vst.msk [vmem:[%s1410_s28] sm:$0xff] %vm171_vm0, %v950_v57  ;;  %v953_v16 = vadd.f32 %v921_v59, %v888_v42  ;;  %v824_v20 = vadd.f32 %v792_v6, %v723_v60  ;;  %v692_v32 = vmul.f32 %v1242_v39, %v1425_v56  ;;  %v333_v35 = vmul.f32 %v1197_v9, %v1310_v28  ;;  %v1471_v57 = vld [vmem:[#allocation2 + $0x90] sm:$0xff]  ;;  %v1485_v6 = vld [vmem:[#allocation2 + $0x81] sm:$0xff] }
  0x57   : > { %983 = vst.msk [vmem:[%s1410_s28 + $0x8] sm:$0xff] %vm171_vm0, %v951_v37  ;;  %v659_v31 = vadd.f32 %v627_v15, %v594_v14  ;;  %v793_v41 = vmul.f32 %v1230_v29, %v1298_v18  ;;  %v494_v2 = vadd.f32 %v462_v22, %v429_v21  ;;  %v563_v4 = vmul.f32 %v1226_v25, %v1316_v33  ;;  %v1504_v21 = vld [vmem:[#allocation2 + $0x98] sm:$0xff] }
  0x58   : > { %984 = vst.msk [vmem:[%s1410_s28 + $0x10] sm:$0xff] %vm171_vm0, %v952_v51  ;;  %v889_v36 = vadd.f32 %v857_v8, %v824_v20  ;;  %v858_v26 = vmul.f32 %v1244_v40, %v1370_v30  ;;  %v365_v28 = vadd.f32 %v1204_v11, %v333_v35  ;;  %v398_v46 = vmul.f32 %v1214_v17, %v1382_v19 }
  0x59   : > { %985 = vst.msk [vmem:[%s1410_s28 + $0x18] sm:$0xff] %vm171_vm0, %v953_v16  ;;  %v724_v49 = vadd.f32 %v692_v32, %v659_v31  ;;  %v923_v18 = vmul.f32 %v1251_v48, %v1446_v34  ;;  %v595_v59 = vadd.f32 %v563_v4, %v494_v2  ;;  %v628_v33 = vmul.f32 %v1240_v38, %v1378_v43  ;;  %v1510_v32 = vld [vmem:[#allocation2 + $0x91] sm:$0xff] }
  0x5a   : > { %v954_v50 = vadd.f32 %v922_v27, %v889_v36  ;;  %v430_v53 = vadd.f32 %v398_v46, %v365_v28  ;;  %v463_v55 = vmul.f32 %v1224_v24, %v1456_v44  ;;  %v334_v58 = vmul.f32 %v1197_v9, %v1346_v0  ;;  %v1508_v27 = vld [vmem:[#allocation2 + $0x82] sm:$0xff] }
  0x5b   : > { %v825_v52 = vadd.f32 %v793_v41, %v724_v49  ;;  %v660_v61 = vadd.f32 %v628_v33, %v595_v59  ;;  %v693_v63 = vmul.f32 %v1242_v39, %v1460_v45  ;;  %v794_v37 = vmul.f32 %v1230_v29, %v1331_v47 }
  0x5c   : > { %986 = vst.msk [vmem:[%s1410_s28 + $0x20] sm:$0xff] %vm171_vm0, %v954_v50  ;;  %v564_v3 = vmul.f32 %v1226_v25, %v1342_v62  ;;  %v495_v51 = vadd.f32 %v463_v55, %v430_v53  ;;  %v366_v0 = vadd.f32 %v1204_v11, %v334_v58  ;;  %v399_v7 = vmul.f32 %v1214_v17, %v1420_v54  ;;  %v1533_v58 = vld [vmem:[#allocation2 + $0xa8] sm:$0xff] }
  0x5d   : > { %v890_v23 = vadd.f32 %v858_v26, %v825_v52  ;;  %v725_v10 = vadd.f32 %v693_v63, %v660_v61  ;;  %v859_v42 = vmul.f32 %v1244_v40, %v1423_v13  ;;  %v629_v47 = vmul.f32 %v1240_v38, %v1425_v56  ;;  %v1529_v52 = vld [vmem:[#allocation2 + $0x92] sm:$0xff] }
  0x5e   : > { %v464_v62 = vmul.f32 %v1224_v24, %v1471_v57  ;;  %v596_v12 = vadd.f32 %v564_v3, %v495_v51  ;;  %v431_v1 = vadd.f32 %v399_v7, %v366_v0  ;;  %v335_v8 = vmul.f32 %v1197_v9, %v1382_v19 }
  0x5f   : > { %v955_v60 = vadd.f32 %v923_v18, %v890_v23  ;;  %v826_v14 = vadd.f32 %v794_v37, %v725_v10  ;;  %v924_v15 = vmul.f32 %v1251_v48, %v1483_v5  ;;  %v694_v16 = vmul.f32 %v1242_v39, %v1485_v6  ;;  %v1541_v37 = vld [vmem:[#allocation2 + $0x99] sm:$0xff] }
  0x60   : > { %v565_v20 = vmul.f32 %v1226_v25, %v1378_v43  ;;  %v661_v22 = vadd.f32 %v629_v47, %v596_v12  ;;  %v496_v31 = vadd.f32 %v464_v62, %v431_v1  ;;  %v367_v19 = vadd.f32 %v1204_v11, %v335_v8  ;;  %v1556_v1 = vld [vmem:[#allocation2 + $0xb0] sm:$0xff]  ;;  %v1558_v8 = vld [vmem:[#allocation2 + $0x9a] sm:$0xff] }
  0x61   : > { %987 = vst.msk [vmem:[%s1410_s28 + $0x28] sm:$0xff] %vm171_vm0, %v955_v60  ;;  %v400_v35 = vmul.f32 %v1214_v17, %v1456_v44  ;;  %v891_v36 = vadd.f32 %v859_v42, %v826_v14  ;;  %v795_v41 = vmul.f32 %v1230_v29, %v1370_v30  ;;  %v860_v43 = vmul.f32 %v1244_v40, %v1446_v34 }
  0x62   : > { %v630_v2 = vmul.f32 %v1240_v38, %v1460_v45  ;;  %v726_v4 = vadd.f32 %v694_v16, %v661_v22  ;;  %v597_v49 = vadd.f32 %v565_v20, %v496_v31  ;;  %v465_v28 = vmul.f32 %v1224_v24, %v1504_v21 }
  0x63   : > { %v432_v26 = vadd.f32 %v400_v35, %v367_v19  ;;  %v956_v46 = vadd.f32 %v924_v15, %v891_v36  ;;  %v925_v50 = vmul.f32 %v1251_v48, %v1508_v27  ;;  %v695_v30 = vmul.f32 %v1242_v39, %v1510_v32  ;;  %v1571_v35 = vld [vmem:[#allocation2 + $0xa9] sm:$0xff] }
  0x64   : > { %v336_v18 = vmul.f32 %v1197_v9, %v1420_v54  ;;  %v827_v59 = vadd.f32 %v795_v41, %v726_v4  ;;  %v662_v33 = vadd.f32 %v630_v2, %v597_v49  ;;  %v566_v55 = vmul.f32 %v1226_v25, %v1425_v56 }
  0x65   : > { %v497_v53 = vadd.f32 %v465_v28, %v432_v26  ;;  %988 = vst.msk [vmem:[%s1410_s28 + $0x30] sm:$0xff] %vm171_vm0, %v956_v46  ;;  %v796_v61 = vmul.f32 %v1230_v29, %v1423_v13  ;;  %v861_v63 = vmul.f32 %v1244_v40, %v1483_v5  ;;  %v401_v3 = vmul.f32 %v1214_v17, %v1471_v57 }
  0x66   : > { %v368_v54 = vadd.f32 %v1204_v11, %v336_v18  ;;  %v892_v23 = vadd.f32 %v860_v43, %v827_v59  ;;  %v727_v51 = vadd.f32 %v695_v30, %v662_v33  ;;  %v631_v0 = vmul.f32 %v1240_v38, %v1485_v6  ;;  %v1585_v30 = vld [vmem:[#allocation2 + $0xc0] sm:$0xff]  ;;  %v1589_v59 = vld [vmem:[#allocation2 + $0xaa] sm:$0xff] }
  0x67   : > { %v598_v56 = vadd.f32 %v566_v55, %v497_v53  ;;  %v926_v13 = vmul.f32 %v1251_v48, %v1529_v52  ;;  %v466_v10 = vmul.f32 %v1224_v24, %v1533_v58  ;;  %v337_v42 = vmul.f32 %v1197_v9, %v1456_v44  ;;  %v1593_v53 = vld [vmem:[#allocation2 + $0xb1] sm:$0xff] }
  0x68   : > { %v433_v7 = vadd.f32 %v401_v3, %v368_v54  ;;  %v957_v47 = vadd.f32 %v925_v50, %v892_v23  ;;  %v828_v62 = vadd.f32 %v796_v61, %v727_v51  ;;  %v696_v12 = vmul.f32 %v1242_v39, %v1541_v37 }
  0x69   : > { %v663_v60 = vadd.f32 %v631_v0, %v598_v56  ;;  %v567_v15 = vmul.f32 %v1226_v25, %v1460_v45  ;;  %v369_v16 = vadd.f32 %v1204_v11, %v337_v42  ;;  %v402_v20 = vmul.f32 %v1214_v17, %v1504_v21  ;;  %v1614_v42 = vld [vmem:[#allocation2 + $0xb2] sm:$0xff] }
  0x6a   : > { %v498_v14 = vadd.f32 %v466_v10, %v433_v7  ;;  %989 = vst.msk [vmem:[%s1410_s28 + $0x38] sm:$0xff] %vm171_vm0, %v957_v47  ;;  %v893_v44 = vadd.f32 %v861_v63, %v828_v62  ;;  %v797_v31 = vmul.f32 %v1230_v29, %v1446_v34  ;;  %v862_v19 = vmul.f32 %v1244_v40, %v1508_v27  ;;  %v1610_v10 = vld [vmem:[#allocation2 + $0xc8] sm:$0xff] }
  0x6b   : > { %v728_v22 = vadd.f32 %v696_v12, %v663_v60  ;;  %v632_v45 = vmul.f32 %v1240_v38, %v1510_v32  ;;  %v434_v41 = vadd.f32 %v402_v20, %v369_v16  ;;  %v467_v43 = vmul.f32 %v1224_v24, %v1556_v1  ;;  %v1625_v20 = vld [vmem:[#allocation2 + $0xc1] sm:$0xff] }
  0x6c   : > { %v599_v36 = vadd.f32 %v567_v15, %v498_v14  ;;  %v958_v2 = vadd.f32 %v926_v13, %v893_v44  ;;  %v927_v49 = vmul.f32 %v1251_v48, %v1558_v8  ;;  %v338_v34 = vmul.f32 %v1197_v9, %v1471_v57 }
  0x6d   : > { %v829_v4 = vadd.f32 %v797_v31, %v728_v22  ;;  %v697_v28 = vmul.f32 %v1242_v39, %v1571_v35  ;;  %v499_v46 = vadd.f32 %v467_v43, %v434_v41  ;;  %v568_v50 = vmul.f32 %v1226_v25, %v1485_v6 }
  0x6e   : > { %v664_v26 = vadd.f32 %v632_v45, %v599_v36  ;;  %990 = vst.msk [vmem:[%s1410_s28 + $0x40] sm:$0xff] %vm171_vm0, %v958_v2  ;;  %v798_v33 = vmul.f32 %v1230_v29, %v1483_v5  ;;  %v370_v57 = vadd.f32 %v1204_v11, %v338_v34  ;;  %v403_v55 = vmul.f32 %v1214_v17, %v1533_v58 }
  0x6f   : > { %v894_v18 = vadd.f32 %v862_v19, %v829_v4  ;;  %v863_v6 = vmul.f32 %v1244_v40, %v1529_v52  ;;  %v600_v63 = vadd.f32 %v568_v50, %v499_v46  ;;  %v633_v54 = vmul.f32 %v1240_v38, %v1541_v37  ;;  %v1647_v46 = vld [vmem:[#allocation2 + $0xc9] sm:$0xff] }
  0x70   : > { %v729_v61 = vadd.f32 %v697_v28, %v664_v26  ;;  %v435_v23 = vadd.f32 %v403_v55, %v370_v57  ;;  %v468_v5 = vmul.f32 %v1224_v24, %v1585_v30  ;;  %v339_v51 = vmul.f32 %v1197_v9, %v1504_v21  ;;  %v1643_v26 = vld [vmem:[#allocation2 + $0xc2] sm:$0xff] }
  0x71   : > { %v959_v3 = vadd.f32 %v927_v49, %v894_v18  ;;  %v928_v0 = vmul.f32 %v1251_v48, %v1589_v59  ;;  %v665_v13 = vadd.f32 %v633_v54, %v600_v63  ;;  %v698_v7 = vmul.f32 %v1242_v39, %v1593_v53  ;;  %v1639_v49 = vld [vmem:[#allocation2 + $0xd8] sm:$0xff] }
  0x72   : > { %v830_v56 = vadd.f32 %v798_v33, %v729_v61  ;;  %v500_v47 = vadd.f32 %v468_v5, %v435_v23  ;;  %v569_v62 = vmul.f32 %v1226_v25, %v1510_v32  ;;  %v371_v21 = vadd.f32 %v1204_v11, %v339_v51  ;;  %v1664_v5 = vld [vmem:[#allocation2 + $0xe0] sm:$0xff]  ;;  %v1668_v51 = vld [vmem:[#allocation2 + $0xca] sm:$0xff] }
  0x73   : > { %991 = vst.msk [vmem:[%s1410_s28 + $0x48] sm:$0xff] %vm171_vm0, %v959_v3  ;;  %v404_v60 = vmul.f32 %v1214_v17, %v1556_v1  ;;  %v730_v14 = vadd.f32 %v698_v7, %v665_v13  ;;  %v799_v15 = vmul.f32 %v1230_v29, %v1508_v27  ;;  %v864_v16 = vmul.f32 %v1244_v40, %v1558_v8 }
  0x74   : > { %v895_v12 = vadd.f32 %v863_v6, %v830_v56  ;;  %v601_v44 = vadd.f32 %v569_v62, %v500_v47  ;;  %v634_v32 = vmul.f32 %v1240_v38, %v1571_v35  ;;  %v469_v31 = vmul.f32 %v1224_v24, %v1610_v10 }
  0x75   : > { %v436_v22 = vadd.f32 %v404_v60, %v371_v21  ;;  %v831_v36 = vadd.f32 %v799_v15, %v730_v14  ;;  %v929_v45 = vmul.f32 %v1251_v48, %v1614_v42  ;;  %v340_v27 = vmul.f32 %v1197_v9, %v1533_v58  ;;  %v1679_v60 = vld [vmem:[#allocation2 + $0xd9] sm:$0xff] }
  0x76   : > { %v960_v19 = vadd.f32 %v928_v0, %v895_v12  ;;  %v666_v41 = vadd.f32 %v634_v32, %v601_v44  ;;  %v699_v43 = vmul.f32 %v1242_v39, %v1625_v20  ;;  %v570_v4 = vmul.f32 %v1226_v25, %v1541_v37 }
  0x77   : > { %v501_v2 = vadd.f32 %v469_v31, %v436_v22  ;;  %v896_v34 = vadd.f32 %v864_v16, %v831_v36  ;;  %v800_v28 = vmul.f32 %v1230_v29, %v1529_v52  ;;  %v372_v58 = vadd.f32 %v1204_v11, %v340_v27 }
  0x78   : > { %992 = vst.msk [vmem:[%s1410_s28 + $0x50] sm:$0xff] %vm171_vm0, %v960_v19  ;;  %v405_v50 = vmul.f32 %v1214_v17, %v1585_v30  ;;  %v731_v18 = vadd.f32 %v699_v43, %v666_v41  ;;  %v865_v37 = vmul.f32 %v1244_v40, %v1589_v59  ;;  %v635_v57 = vmul.f32 %v1240_v38, %v1593_v53  ;;  %v1697_v41 = vld [vmem:[#allocation2 + $0xda] sm:$0xff] }
  0x79   : > { %v602_v33 = vadd.f32 %v570_v4, %v501_v2  ;;  %v961_v55 = vadd.f32 %v929_v45, %v896_v34  ;;  %v470_v52 = vmul.f32 %v1224_v24, %v1639_v49  ;;  %v341_v6 = vmul.f32 %v1197_v9, %v1556_v1  ;;  %v1693_v45 = vld [vmem:[#allocation2 + $0xf0] sm:$0xff]  ;;  %v1701_v2 = vld [vmem:[#allocation2 + $0xe1] sm:$0xff] }
  0x7a   : > { %v437_v61 = vadd.f32 %v405_v50, %v372_v58  ;;  %v832_v63 = vadd.f32 %v800_v28, %v731_v18  ;;  %v930_v54 = vmul.f32 %v1251_v48, %v1643_v26  ;;  %v700_v23 = vmul.f32 %v1242_v39, %v1647_v46 }
  0x7b   : > { %v667_v3 = vadd.f32 %v635_v57, %v602_v33  ;;  %993 = vst.msk [vmem:[%s1410_s28 + $0x58] sm:$0xff] %vm171_vm0, %v961_v55  ;;  %v571_v0 = vmul.f32 %v1226_v25, %v1571_v35  ;;  %v373_v1 = vadd.f32 %v1204_v11, %v341_v6  ;;  %v406_v13 = vmul.f32 %v1214_v17, %v1610_v10  ;;  %v1722_v6 = vld [vmem:[#allocation2 + $0xe2] sm:$0xff] }
  0x7c   : > { %v502_v56 = vadd.f32 %v470_v52, %v437_v61  ;;  %v897_v7 = vadd.f32 %v865_v37, %v832_v63  ;;  %v801_v62 = vmul.f32 %v1230_v29, %v1558_v8  ;;  %v866_v21 = vmul.f32 %v1244_v40, %v1614_v42  ;;  %v1718_v52 = vld [vmem:[#allocation2 + $0xf8] sm:$0xff] }
  0x7d   : > { %v732_v47 = vadd.f32 %v700_v23, %v667_v3  ;;  %v636_v35 = vmul.f32 %v1240_v38, %v1625_v20  ;;  %v438_v14 = vadd.f32 %v406_v13, %v373_v1  ;;  %v471_v15 = vmul.f32 %v1224_v24, %v1664_v5  ;;  %v1733_v13 = vld [vmem:[#allocation2 + $0xf1] sm:$0xff] }
  0x7e   : > { %v603_v12 = vadd.f32 %v571_v0, %v502_v56  ;;  %v962_v16 = vadd.f32 %v930_v54, %v897_v7  ;;  %v931_v32 = vmul.f32 %v1251_v48, %v1668_v51  ;;  %v342_v8 = vmul.f32 %v1197_v9, %v1585_v30 }
  0x7f   : > { %v833_v44 = vadd.f32 %v801_v62, %v732_v47  ;;  %v701_v31 = vmul.f32 %v1242_v39, %v1679_v60  ;;  %v503_v19 = vadd.f32 %v471_v15, %v438_v14  ;;  %v572_v36 = vmul.f32 %v1226_v25, %v1593_v53 }
  0x80   : > { %v668_v22 = vadd.f32 %v636_v35, %v603_v12  ;;  %994 = vst.msk [vmem:[%s1410_s28 + $0x60] sm:$0xff] %vm171_vm0, %v962_v16  ;;  %v802_v43 = vmul.f32 %v1230_v29, %v1589_v59  ;;  %v374_v30 = vadd.f32 %v1204_v11, %v342_v8  ;;  %v407_v4 = vmul.f32 %v1214_v17, %v1639_v49 }
  0x81   : > { %v898_v27 = vadd.f32 %v866_v21, %v833_v44  ;;  %v867_v53 = vmul.f32 %v1244_v40, %v1643_v26  ;;  %v604_v28 = vadd.f32 %v572_v36, %v503_v19  ;;  %v637_v58 = vmul.f32 %v1240_v38, %v1647_v46  ;;  %v1755_v19 = vld [vmem:[#allocation2 + $0xf9] sm:$0xff] }
  0x82   : > { %v733_v34 = vadd.f32 %v701_v31, %v668_v22  ;;  %v439_v18 = vadd.f32 %v407_v4, %v374_v30  ;;  %v472_v59 = vmul.f32 %v1224_v24, %v1693_v45  ;;  %v343_v37 = vmul.f32 %v1197_v9, %v1610_v10  ;;  %v1751_v22 = vld [vmem:[#allocation2 + $0xf2] sm:$0xff] }
  0x83   : > { %v963_v50 = vadd.f32 %v931_v32, %v898_v27  ;;  %v932_v57 = vmul.f32 %v1251_v48, %v1697_v41  ;;  %v669_v55 = vadd.f32 %v637_v58, %v604_v28  ;;  %v702_v61 = vmul.f32 %v1242_v39, %v1701_v2  ;;  %v1747_v32 = vld [vmem:[#allocation2 + $0x108] sm:$0xff] }
  0x84   : > { %v834_v33 = vadd.f32 %v802_v43, %v733_v34  ;;  %v504_v63 = vadd.f32 %v472_v59, %v439_v18  ;;  %v573_v54 = vmul.f32 %v1226_v25, %v1625_v20  ;;  %v375_v10 = vadd.f32 %v1204_v11, %v343_v37  ;;  %v1772_v59 = vld [vmem:[#allocation2 + $0x110] sm:$0xff]  ;;  %v1776_v37 = vld [vmem:[#allocation2 + $0xfa] sm:$0xff] }
  0x85   : > { %995 = vst.msk [vmem:[%s1410_s28 + $0x68] sm:$0xff] %vm171_vm0, %v963_v50  ;;  %v408_v3 = vmul.f32 %v1214_v17, %v1664_v5  ;;  %v734_v56 = vadd.f32 %v702_v61, %v669_v55  ;;  %v803_v0 = vmul.f32 %v1230_v29, %v1614_v42  ;;  %v868_v1 = vmul.f32 %v1244_v40, %v1668_v51 }
  0x86   : > { %v899_v23 = vadd.f32 %v867_v53, %v834_v33  ;;  %v605_v7 = vadd.f32 %v573_v54, %v504_v63  ;;  %v638_v20 = vmul.f32 %v1240_v38, %v1679_v60  ;;  %v473_v62 = vmul.f32 %v1224_v24, %v1718_v52 }
  0x87   : > { %v440_v47 = vadd.f32 %v408_v3, %v375_v10  ;;  %v835_v12 = vadd.f32 %v803_v0, %v734_v56  ;;  %v933_v35 = vmul.f32 %v1251_v48, %v1722_v6  ;;  %v344_v42 = vmul.f32 %v1197_v9, %v1639_v49  ;;  %v1787_v3 = vld [vmem:[#allocation2 + $0x109] sm:$0xff] }
  0x88   : > { %v964_v21 = vadd.f32 %v932_v57, %v899_v23  ;;  %v670_v14 = vadd.f32 %v638_v20, %v605_v7  ;;  %v703_v15 = vmul.f32 %v1242_v39, %v1733_v13  ;;  %v574_v44 = vmul.f32 %v1226_v25, %v1647_v46 }
  0x89   : > { %v505_v16 = vadd.f32 %v473_v62, %v440_v47  ;;  %v900_v8 = vadd.f32 %v868_v1, %v835_v12  ;;  %v804_v31 = vmul.f32 %v1230_v29, %v1643_v26  ;;  %v376_v49 = vadd.f32 %v1204_v11, %v344_v42 }
  0x8a   : > { %996 = vst.msk [vmem:[%s1410_s28 + $0x70] sm:$0xff] %vm171_vm0, %v964_v21  ;;  %v409_v36 = vmul.f32 %v1214_v17, %v1693_v45  ;;  %v735_v27 = vadd.f32 %v703_v15, %v670_v14  ;;  %v869_v46 = vmul.f32 %v1244_v40, %v1697_v41  ;;  %v639_v30 = vmul.f32 %v1240_v38, %v1701_v2  ;;  %v1805_v14 = vld [vmem:[#allocation2 + $0x10a] sm:$0xff] }
  0x8b   : > { %v606_v43 = vadd.f32 %v574_v44, %v505_v16  ;;  %v965_v4 = vadd.f32 %v933_v35, %v900_v8  ;;  %v474_v26 = vmul.f32 %v1224_v24, %v1747_v32  ;;  %v345_v53 = vmul.f32 %v1197_v9, %v1664_v5  ;;  %v1801_v35 = vld [vmem:[#allocation2 + $0x120] sm:$0xff]  ;;  %v1809_v16 = vld [vmem:[#allocation2 + $0x111] sm:$0xff] }
  0x8c   : > { %v441_v34 = vadd.f32 %v409_v36, %v376_v49  ;;  %v836_v28 = vadd.f32 %v804_v31, %v735_v27  ;;  %v934_v58 = vmul.f32 %v1251_v48, %v1751_v22  ;;  %v704_v18 = vmul.f32 %v1242_v39, %v1755_v19 }
  0x8d   : > { %v671_v50 = vadd.f32 %v639_v30, %v606_v43  ;;  %997 = vst.msk [vmem:[%s1410_s28 + $0x78] sm:$0xff] %vm171_vm0, %v965_v4  ;;  %v575_v57 = vmul.f32 %v1226_v25, %v1679_v60  ;;  %v377_v5 = vadd.f32 %v1204_v11, %v345_v53  ;;  %v410_v55 = vmul.f32 %v1214_v17, %v1718_v52 }
  0x8e   : > { %v506_v33 = vadd.f32 %v474_v26, %v441_v34  ;;  %v901_v61 = vadd.f32 %v869_v46, %v836_v28  ;;  %v805_v54 = vmul.f32 %v1230_v29, %v1668_v51  ;;  %v870_v10 = vmul.f32 %v1244_v40, %v1722_v6  ;;  %v1826_v34 = vld [vmem:[#allocation2 + $0x128] sm:$0xff]  ;;  %v1830_v26 = vld [vmem:[#allocation2 + $0x112] sm:$0xff] }
  0x8f   : > { %v736_v63 = vadd.f32 %v704_v18, %v671_v50  ;;  %v640_v60 = vmul.f32 %v1240_v38, %v1733_v13  ;;  %v442_v56 = vadd.f32 %v410_v55, %v377_v5  ;;  %v475_v0 = vmul.f32 %v1224_v24, %v1772_v59 }
  0x90   : > { %v607_v23 = vadd.f32 %v575_v57, %v506_v33  ;;  %v966_v1 = vadd.f32 %v934_v58, %v901_v61  ;;  %v935_v20 = vmul.f32 %v1251_v48, %v1776_v37  ;;  %v346_v51 = vmul.f32 %v1197_v9, %v1693_v45 }
  0x91   : > { %v837_v7 = vadd.f32 %v805_v54, %v736_v63  ;;  %v705_v62 = vmul.f32 %v1242_v39, %v1787_v3  ;;  %v507_v21 = vadd.f32 %v475_v0, %v442_v56  ;;  %v576_v12 = vmul.f32 %v1226_v25, %v1701_v2 }
  0x92   : > { %v672_v47 = vadd.f32 %v640_v60, %v607_v23  ;;  %998 = vst.msk [vmem:[%s1410_s28 + $0x80] sm:$0xff] %vm171_vm0, %v966_v1  ;;  %v806_v15 = vmul.f32 %v1230_v29, %v1697_v41  ;;  %v378_v45 = vadd.f32 %v1204_v11, %v346_v51  ;;  %v411_v44 = vmul.f32 %v1214_v17, %v1747_v32 }
  0x93   : > { %v902_v42 = vadd.f32 %v870_v10, %v837_v7  ;;  %v871_v2 = vmul.f32 %v1244_v40, %v1751_v22  ;;  %v608_v31 = vadd.f32 %v576_v12, %v507_v21  ;;  %v641_v49 = vmul.f32 %v1240_v38, %v1755_v19  ;;  %v1868_v21 = vld [vmem:[#allocation2 + $0x129] sm:$0xff] }
  0x94   : > { %v737_v8 = vadd.f32 %v705_v62, %v672_v47  ;;  %v443_v27 = vadd.f32 %v411_v44, %v378_v45  ;;  %v476_v41 = vmul.f32 %v1224_v24, %v1801_v35  ;;  %v347_v46 = vmul.f32 %v1197_v9, %v1718_v52  ;;  %v1837_v52 = vld [vmem:[%s2121_s2] ss:$0 sm:$0xff]  ;;  %v1864_v47 = vld [vmem:[#allocation2 + $0x122] sm:$0xff] }
  0x95   : > { %v967_v36 = vadd.f32 %v935_v20, %v902_v42  ;;  %v936_v43 = vmul.f32 %v1251_v48, %v1805_v14  ;;  %v673_v30 = vadd.f32 %v641_v49, %v608_v31  ;;  %v706_v4 = vmul.f32 %v1242_v39, %v1809_v16  ;;  %v1860_v20 = vld [vmem:[#allocation2 + $0x138] sm:$0xff] }
  0x96   : > { %v838_v11 = vadd.f32 %v806_v15, %v737_v8  ;;  %v508_v53 = vadd.f32 %v476_v41, %v443_v27  ;;  %v577_v28 = vmul.f32 %v1226_v25, %v1733_v13  ;;  %v379_v58 = vadd.f32 %v1837_v52, %v347_v46  ;;  %v1846_v13 = vld [vmem:[#allocation2 + $0x121] sm:$0xff]  ;;  %v1889_v46 = vld [vmem:[#allocation2 + $0x12a] sm:$0xff] }
  0x97   : > { %999 = vst.msk [vmem:[%s1410_s28 + $0x88] sm:$0xff] %vm171_vm0, %v967_v36  ;;  %v412_v50 = vmul.f32 %v1214_v17, %v1772_v59  ;;  %v738_v33 = vadd.f32 %v706_v4, %v673_v30  ;;  %v807_v57 = vmul.f32 %v1230_v29, %v1722_v6  ;;  %v872_v5 = vmul.f32 %v1244_v40, %v1776_v37  ;;  %v1885_v41 = vld [vmem:[#allocation2 + $0x140] sm:$0xff] }
  0x98   : > { %v903_v18 = vadd.f32 %v871_v2, %v838_v11  ;;  %v609_v55 = vadd.f32 %v577_v28, %v508_v53  ;;  %v642_v61 = vmul.f32 %v1240_v38, %v1787_v3  ;;  %v477_v54 = vmul.f32 %v1224_v24, %v1826_v34 }
  0x99   : > { %v444_v63 = vadd.f32 %v412_v50, %v379_v58  ;;  %v839_v23 = vadd.f32 %v807_v57, %v738_v33  ;;  %v937_v60 = vmul.f32 %v1251_v48, %v1830_v26  ;;  %v348_v6 = vmul.f32 %v1197_v9, %v1747_v32  ;;  %v1900_v50 = vld [vmem:[#allocation2 + $0x139] sm:$0xff] }
  0x9a   : > { %v968_v10 = vadd.f32 %v936_v43, %v903_v18  ;;  %v674_v56 = vadd.f32 %v642_v61, %v609_v55  ;;  %v707_v0 = vmul.f32 %v1242_v39, %v1846_v13  ;;  %v578_v7 = vmul.f32 %v1226_v25, %v1755_v19 }
  0x9b   : > { %v509_v1 = vadd.f32 %v477_v54, %v444_v63  ;;  %v904_v51 = vadd.f32 %v872_v5, %v839_v23  ;;  %v808_v62 = vmul.f32 %v1230_v29, %v1751_v22  ;;  %v380_v32 = vadd.f32 %v1837_v52, %v348_v6 }
  0x9c   : > { %1000 = vst.msk [vmem:[%s1410_s28 + $0x90] sm:$0xff] %vm171_vm0, %v968_v10  ;;  %v413_v12 = vmul.f32 %v1214_v17, %v1801_v35  ;;  %v739_v42 = vadd.f32 %v707_v0, %v674_v56  ;;  %v873_v19 = vmul.f32 %v1244_v40, %v1805_v14  ;;  %v643_v45 = vmul.f32 %v1240_v38, %v1809_v16  ;;  %v1918_v56 = vld [vmem:[#allocation2 + $0x13a] sm:$0xff] }
  0x9d   : > { %v610_v15 = vadd.f32 %v578_v7, %v509_v1  ;;  %v969_v44 = vadd.f32 %v937_v60, %v904_v51  ;;  %v478_v22 = vmul.f32 %v1224_v24, %v1860_v20  ;;  %v349_v2 = vmul.f32 %v1197_v9, %v1772_v59  ;;  %v1914_v60 = vld [vmem:[#allocation2 + $0x150] sm:$0xff]  ;;  %v1922_v1 = vld [vmem:[#allocation2 + $0x141] sm:$0xff] }
  0x9e   : > { %v445_v8 = vadd.f32 %v413_v12, %v380_v32  ;;  %v840_v31 = vadd.f32 %v808_v62, %v739_v42  ;;  %v938_v49 = vmul.f32 %v1251_v48, %v1864_v47  ;;  %v708_v27 = vmul.f32 %v1242_v39, %v1868_v21 }
  0x9f   : > { %v675_v36 = vadd.f32 %v643_v45, %v610_v15  ;;  %1001 = vst.msk [vmem:[%s1410_s28 + $0x98] sm:$0xff] %vm171_vm0, %v969_v44  ;;  %v579_v43 = vmul.f32 %v1226_v25, %v1787_v3  ;;  %v381_v59 = vadd.f32 %v1837_v52, %v349_v2  ;;  %v414_v30 = vmul.f32 %v1214_v17, %v1826_v34  ;;  %v1943_v2 = vld [vmem:[#allocation2 + $0x142] sm:$0xff] }
  0xa0   : > { %v510_v11 = vadd.f32 %v478_v22, %v445_v8  ;;  %v905_v4 = vadd.f32 %v873_v19, %v840_v31  ;;  %v809_v28 = vmul.f32 %v1230_v29, %v1776_v37  ;;  %v874_v58 = vmul.f32 %v1244_v40, %v1830_v26  ;;  %v1939_v22 = vld [vmem:[#allocation2 + $0x158] sm:$0xff] }
  0xa1   : > { %v740_v53 = vadd.f32 %v708_v27, %v675_v36  ;;  %v644_v3 = vmul.f32 %v1240_v38, %v1846_v13  ;;  %v446_v33 = vadd.f32 %v414_v30, %v381_v59  ;;  %v479_v57 = vmul.f32 %v1224_v24, %v1885_v41  ;;  %v1954_v30 = vld [vmem:[#allocation2 + $0x151] sm:$0xff] }
  0xa2   : > { %v611_v18 = vadd.f32 %v579_v43, %v510_v11  ;;  %v970_v5 = vadd.f32 %v938_v49, %v905_v4  ;;  %v939_v61 = vmul.f32 %v1251_v48, %v1889_v46  ;;  %v350_v37 = vmul.f32 %v1197_v9, %v1801_v35 }
  0xa3   : > { %v841_v55 = vadd.f32 %v809_v28, %v740_v53  ;;  %v709_v54 = vmul.f32 %v1242_v39, %v1900_v50  ;;  %v511_v10 = vadd.f32 %v479_v57, %v446_v33  ;;  %v580_v23 = vmul.f32 %v1226_v25, %v1809_v16 }
  0xa4   : > { %v676_v63 = vadd.f32 %v644_v3, %v611_v18  ;;  %1002 = vst.msk [vmem:[%s1410_s28 + $0xa0] sm:$0xff] %vm171_vm0, %v970_v5  ;;  %v810_v0 = vmul.f32 %v1230_v29, %v1805_v14  ;;  %v382_v35 = vadd.f32 %v1837_v52, %v350_v37  ;;  %v415_v7 = vmul.f32 %v1214_v17, %v1860_v20 }
  0xa5   : > { %v906_v6 = vadd.f32 %v874_v58, %v841_v55  ;;  %v875_v16 = vmul.f32 %v1244_v40, %v1864_v47  ;;  %v612_v62 = vadd.f32 %v580_v23, %v511_v10  ;;  %v645_v32 = vmul.f32 %v1240_v38, %v1868_v21  ;;  %v1976_v10 = vld [vmem:[#allocation2 + $0x159] sm:$0xff] }
  0xa6   : > { %v741_v51 = vadd.f32 %v709_v54, %v676_v63  ;;  %v447_v42 = vadd.f32 %v415_v7, %v382_v35  ;;  %v480_v14 = vmul.f32 %v1224_v24, %v1914_v60  ;;  %v351_v19 = vmul.f32 %v1197_v9, %v1826_v34  ;;  %v1972_v63 = vld [vmem:[#allocation2 + $0x152] sm:$0xff] }
  0xa7   : > { %v971_v12 = vadd.f32 %v939_v61, %v906_v6  ;;  %v940_v45 = vmul.f32 %v1251_v48, %v1918_v56  ;;  %v677_v44 = vadd.f32 %v645_v32, %v612_v62  ;;  %v710_v8 = vmul.f32 %v1242_v39, %v1922_v1  ;;  %v1968_v61 = vld [vmem:[#allocation2 + $0x168] sm:$0xff] }
  0xa8   : > { %v842_v15 = vadd.f32 %v810_v0, %v741_v51  ;;  %v512_v31 = vadd.f32 %v480_v14, %v447_v42  ;;  %v581_v49 = vmul.f32 %v1226_v25, %v1846_v13  ;;  %v383_v34 = vadd.f32 %v1837_v52, %v351_v19  ;;  %v1993_v14 = vld [vmem:[#allocation2 + $0x170] sm:$0xff]  ;;  %v1997_v19 = vld [vmem:[#allocation2 + $0x15a] sm:$0xff] }
  0xa9   : > { %1003 = vst.msk [vmem:[%s1410_s28 + $0xa8] sm:$0xff] %vm171_vm0, %v971_v12  ;;  %v416_v36 = vmul.f32 %v1214_v17, %v1885_v41  ;;  %v742_v11 = vadd.f32 %v710_v8, %v677_v44  ;;  %v811_v43 = vmul.f32 %v1230_v29, %v1830_v26  ;;  %v876_v59 = vmul.f32 %v1244_v40, %v1889_v46 }
  0xaa   : > { %v907_v27 = vadd.f32 %v875_v16, %v842_v15  ;;  %v613_v4 = vadd.f32 %v581_v49, %v512_v31  ;;  %v646_v13 = vmul.f32 %v1240_v38, %v1900_v50  ;;  %v481_v28 = vmul.f32 %v1224_v24, %v1939_v22 }
  0xab   : > { %v448_v53 = vadd.f32 %v416_v36, %v383_v34  ;;  %v843_v18 = vadd.f32 %v811_v43, %v742_v11  ;;  %v941_v3 = vmul.f32 %v1251_v48, %v1943_v2  ;;  %v352_v26 = vmul.f32 %v1197_v9, %v1860_v20  ;;  %v2008_v36 = vld [vmem:[#allocation2 + $0x169] sm:$0xff] }
  0xac   : > { %v972_v58 = vadd.f32 %v940_v45, %v907_v27  ;;  %v678_v33 = vadd.f32 %v646_v13, %v613_v4  ;;  %v711_v57 = vmul.f32 %v1242_v39, %v1954_v30  ;;  %v582_v55 = vmul.f32 %v1226_v25, %v1868_v21 }
  0xad   : > { %v513_v5 = vadd.f32 %v481_v28, %v448_v53  ;;  %v908_v37 = vadd.f32 %v876_v59, %v843_v18  ;;  %v812_v54 = vmul.f32 %v1230_v29, %v1864_v47  ;;  %v384_v20 = vadd.f32 %v1837_v52, %v352_v26 }
  0xae   : > { %1004 = vst.msk [vmem:[%s1410_s28 + $0xb0] sm:$0xff] %vm171_vm0, %v972_v58  ;;  %v417_v23 = vmul.f32 %v1214_v17, %v1914_v60  ;;  %v743_v6 = vadd.f32 %v711_v57, %v678_v33  ;;  %v877_v21 = vmul.f32 %v1244_v40, %v1918_v56  ;;  %v647_v35 = vmul.f32 %v1240_v38, %v1922_v1  ;;  %v2024_v33 = vld [vmem:[#allocation2 + $0x16a] sm:$0xff] }
  0xaf   : > { %v614_v0 = vadd.f32 %v582_v55, %v513_v5  ;;  %v973_v7 = vadd.f32 %v941_v3, %v908_v37  ;;  %v482_v47 = vmul.f32 %v1224_v24, %v1968_v61  ;;  %v353_v16 = vmul.f32 %v1197_v9, %v1885_v41  ;;  %v321_v3 = vld [vmem:[#allocation2 + $0x180] sm:$0xff]  ;;  %v2028_v5 = vld [vmem:[#allocation2 + $0x171] sm:$0xff] }
  0xb0   : > { %v449_v51 = vadd.f32 %v417_v23, %v384_v20  ;;  %v844_v62 = vadd.f32 %v812_v54, %v743_v6  ;;  %v942_v32 = vmul.f32 %v1251_v48, %v1972_v63  ;;  %v712_v42 = vmul.f32 %v1242_v39, %v1976_v10 }
  0xb1   : > { %v679_v12 = vadd.f32 %v647_v35, %v614_v0  ;;  %1005 = vst.msk [vmem:[%s1410_s28 + $0xb8] sm:$0xff] %vm171_vm0, %v973_v7  ;;  %v583_v45 = vmul.f32 %v1226_v25, %v1900_v50  ;;  %v385_v41 = vadd.f32 %v1837_v52, %v353_v16  ;;  %v418_v44 = vmul.f32 %v1214_v17, %v1939_v22 }
  0xb2   : > { %v514_v15 = vadd.f32 %v482_v47, %v449_v51  ;;  %v909_v8 = vadd.f32 %v877_v21, %v844_v62  ;;  %v813_v49 = vmul.f32 %v1230_v29, %v1889_v46  ;;  %v878_v34 = vmul.f32 %v1244_v40, %v1943_v2  ;;  %v322_v47 = vld [vmem:[#allocation2 + $0x188] sm:$0xff] }
  0xb3   : > { %v744_v31 = vadd.f32 %v712_v42, %v679_v12  ;;  %v648_v50 = vmul.f32 %v1240_v38, %v1954_v30  ;;  %v450_v11 = vadd.f32 %v418_v44, %v385_v41  ;;  %v483_v43 = vmul.f32 %v1224_v24, %v1993_v14  ;;  %v552_v41 = vld [vmem:[#allocation2 + $0x181] sm:$0xff]  ;;  %v2055_v44 = vld [vmem:[#allocation2 + $0x172] sm:$0xff] }
  0xb4   : > { %v615_v27 = vadd.f32 %v583_v45, %v514_v15  ;;  %v974_v59 = vadd.f32 %v942_v32, %v909_v8  ;;  %v943_v13 = vmul.f32 %v1251_v48, %v1997_v19  ;;  %v354_v46 = vmul.f32 %v1197_v9, %v1914_v60 }
  0xb5   : > { %v845_v4 = vadd.f32 %v813_v49, %v744_v31  ;;  %v713_v28 = vmul.f32 %v1242_v39, %v2008_v36  ;;  %v515_v58 = vadd.f32 %v483_v43, %v450_v11  ;;  %v584_v18 = vmul.f32 %v1226_v25, %v1922_v1 }
  0xb6   : > { %v680_v53 = vadd.f32 %v648_v50, %v615_v27  ;;  %1006 = vst.msk [vmem:[%s1410_s28 + $0xc0] sm:$0xff] %vm171_vm0, %v974_v59  ;;  %v814_v57 = vmul.f32 %v1230_v29, %v1918_v56  ;;  %v386_v60 = vadd.f32 %v1837_v52, %v354_v46  ;;  %v419_v55 = vmul.f32 %v1214_v17, %v1968_v61 }
  0xb7   : > { %v910_v26 = vadd.f32 %v878_v34, %v845_v4  ;;  %v879_v1 = vmul.f32 %v1244_v40, %v1972_v63  ;;  %v616_v54 = vadd.f32 %v584_v18, %v515_v58  ;;  %v649_v20 = vmul.f32 %v1240_v38, %v1976_v10  ;;  %v323_v34 = vld [vmem:[#allocation2 + $0x198] sm:$0xff] }
  0xb8   : > { %v745_v37 = vadd.f32 %v713_v28, %v680_v53  ;;  %v451_v6 = vadd.f32 %v419_v55, %v386_v60  ;;  %v484_v56 = vmul.f32 %v1224_v24, %v321_v3  ;;  %v355_v21 = vmul.f32 %v1197_v9, %v1939_v22  ;;  %v553_v28 = vld [vmem:[#allocation2 + $0x189] sm:$0xff] }
  0xb9   : > { %v975_v23 = vadd.f32 %v943_v13, %v910_v26  ;;  %v944_v35 = vmul.f32 %v1251_v48, %v2024_v33  ;;  %v681_v7 = vadd.f32 %v649_v20, %v616_v54  ;;  %v714_v51 = vmul.f32 %v1242_v39, %v2028_v5  ;;  %v783_v55 = vld [vmem:[#allocation2 + $0x182] sm:$0xff] }
  0xba   : > { %v846_v0 = vadd.f32 %v814_v57, %v745_v37  ;;  %v516_v16 = vadd.f32 %v484_v56, %v451_v6  ;;  %v585_v62 = vmul.f32 %v1226_v25, %v1954_v30  ;;  %v387_v32 = vadd.f32 %v1837_v52, %v355_v21  ;;  %v324_v57 = vld [vmem:[#allocation2 + $0x1a0] sm:$0xff] }
  0xbb   : > { %1007 = vst.msk [vmem:[%s1410_s28 + $0xc8] sm:$0xff] %vm171_vm0, %v975_v23  ;;  %v420_v22 = vmul.f32 %v1214_v17, %v1993_v14  ;;  %v746_v42 = vadd.f32 %v714_v51, %v681_v7  ;;  %v815_v15 = vmul.f32 %v1230_v29, %v1943_v2  ;;  %v880_v45 = vmul.f32 %v1244_v40, %v1997_v19 }
  0xbc   : > { %v911_v12 = vadd.f32 %v879_v1, %v846_v0  ;;  %v617_v8 = vadd.f32 %v585_v62, %v516_v16  ;;  %v650_v30 = vmul.f32 %v1240_v38, %v2008_v36  ;;  %v485_v49 = vmul.f32 %v1224_v24, %v322_v47  ;;  %v554_v16 = vld [vmem:[#allocation2 + $0x199] sm:$0xff] }
  0xbd   : > { %v452_v31 = vadd.f32 %v420_v22, %v387_v32  ;;  %v847_v50 = vadd.f32 %v815_v15, %v746_v42  ;;  %v356_v2 = vmul.f32 %v1197_v9, %v1968_v61  ;;  %v421_v11 = vmul.f32 %v1214_v17, %v321_v3 }
  0xbe   : > { %v976_v27 = vadd.f32 %v944_v35, %v911_v12  ;;  %v682_v43 = vadd.f32 %v650_v30, %v617_v8  ;;  %v715_v59 = vmul.f32 %v1242_v39, %v552_v41  ;;  %v586_v13 = vmul.f32 %v1226_v25, %v1976_v10 }
  0xbf   : > { %v517_v4 = vadd.f32 %v485_v49, %v452_v31  ;;  %v912_v46 = vadd.f32 %v880_v45, %v847_v50  ;;  %v945_v53 = vmul.f32 %v1251_v48, %v2055_v44  ;;  %v388_v58 = vadd.f32 %v1837_v52, %v356_v2 }
  0xc0   : > { %1008 = vst.msk [vmem:[%s1410_s28 + $0xd0] sm:$0xff] %vm171_vm0, %v976_v27  ;;  %v486_v61 = vmul.f32 %v1224_v24, %v323_v34  ;;  %v747_v18 = vadd.f32 %v715_v59, %v682_v43  ;;  %v816_v3 = vmul.f32 %v1230_v29, %v1972_v63  ;;  %v651_v10 = vmul.f32 %v1240_v38, %v2028_v5  ;;  %v785_v27 = vld [vmem:[#allocation2 + $0x19a] sm:$0xff] }
  0xc1   : > { %v618_v26 = vadd.f32 %v586_v13, %v517_v4  ;;  %v977_v60 = vadd.f32 %v945_v53, %v912_v46  ;;  %v881_v37 = vmul.f32 %v1244_v40, %v2024_v33  ;;  %v453_v1 = vadd.f32 %v421_v11, %v388_v58 }
  0xc2   : > { %v357_v54 = vmul.f32 %v1197_v9, %v1993_v14  ;;  %v848_v20 = vadd.f32 %v816_v3, %v747_v18  ;;  %v716_v6 = vmul.f32 %v1242_v39, %v553_v28  ;;  %v422_v63 = vmul.f32 %v1214_v17, %v322_v47  ;;  %v784_v17 = vld [vmem:[#allocation2 + $0x18a] sm:$0xff] }
  0xc3   : > { %v683_v23 = vadd.f32 %v651_v10, %v618_v26  ;;  %1009 = vst.msk [vmem:[%s1410_s28 + $0xd8] sm:$0xff] %vm171_vm0, %v977_v60  ;;  %v518_v56 = vadd.f32 %v486_v61, %v453_v1  ;;  %v587_v21 = vmul.f32 %v1226_v25, %v2008_v36  ;;  %v487_v35 = vmul.f32 %v1224_v24, %v324_v57 }
  0xc4   : > { %v389_v0 = vadd.f32 %v1837_v52, %v357_v54  ;;  %v913_v7 = vadd.f32 %v881_v37, %v848_v20  ;;  %v946_v9 = vmul.f32 %v1251_v48, %v783_v55  ;;  %v817_v51 = vmul.f32 %v1230_v29, %v1997_v19 }
  0xc5   : > { %v748_v14 = vadd.f32 %v716_v6, %v683_v23  ;;  %v619_v47 = vadd.f32 %v587_v21, %v518_v56  ;;  %v652_v62 = vmul.f32 %v1240_v38, %v552_v41  ;;  %v882_v52 = vmul.f32 %v1244_v40, %v2055_v44  ;;  %v555_v41 = vld [vmem:[#allocation2 + $0x1a1] sm:$0xff] }
  0xc6   : > { %v454_v32 = vadd.f32 %v422_v63, %v389_v0  ;;  %v978_v22 = vadd.f32 %v946_v9, %v913_v7  ;;  %v717_v12 = vmul.f32 %v1242_v39, %v554_v16  ;;  %v588_v15 = vmul.f32 %v1226_v25, %v2028_v5 }
  0xc7   : > { %v849_v36 = vadd.f32 %v817_v51, %v748_v14  ;;  %v684_v24 = vadd.f32 %v652_v62, %v619_v47  ;;  %v947_v45 = vmul.f32 %v1251_v48, %v784_v17  ;;  %v818_v30 = vmul.f32 %v1230_v29, %v2024_v33 }
  0xc8   : > { %v519_v42 = vadd.f32 %v487_v35, %v454_v32  ;;  %1010 = vst.msk [vmem:[%s1410_s28 + $0xe0] sm:$0xff] %vm171_vm0, %v978_v22  ;;  %v653_v49 = vmul.f32 %v1240_v38, %v553_v28  ;;  %v883_v2 = vmul.f32 %v1244_v40, %v783_v55  ;;  %v718_v5 = vmul.f32 %v1242_v39, %v555_v41  ;;  %v786_v38 = vld [vmem:[#allocation2 + $0x1a2] sm:$0xff] }
  0xc9   : > { %v914_v19 = vadd.f32 %v882_v52, %v849_v36  ;;  %v749_v8 = vadd.f32 %v717_v12, %v684_v24  ;;  %v948_v43 = vmul.f32 %v1251_v48, %v785_v27  ;;  %v819_v33 = vmul.f32 %v1230_v29, %v2055_v44 }
  0xca   : > { %v620_v31 = vadd.f32 %v588_v15, %v519_v42  ;;  %v884_v46 = vmul.f32 %v1244_v40, %v784_v17  ;;  %v949_v28 = vmul.f32 %v1251_v48, %v786_v38 }
  0xcb   : > { %v979_v34 = vadd.f32 %v947_v45, %v914_v19  ;;  %v850_v50 = vadd.f32 %v818_v30, %v749_v8 }
  0xcc   : > { %v685_v25 = vadd.f32 %v653_v49, %v620_v31 }
  0xcd   : > { %1011 = vst.msk [vmem:[%s1410_s28 + $0xe8] sm:$0xff] %vm171_vm0, %v979_v34  ;;  %v915_v11 = vadd.f32 %v883_v2, %v850_v50 }
  0xce   : > { %v750_v59 = vadd.f32 %v718_v5, %v685_v25 }
  0xcf   : > { %v980_v4 = vadd.f32 %v948_v43, %v915_v11 }
  0xd0   : > { %v851_v13 = vadd.f32 %v819_v33, %v750_v59 }
  0xd1   : > { %1012 = vst.msk [vmem:[%s1410_s28 + $0xf0] sm:$0xff] %vm171_vm0, %v980_v4 }
  0xd2   : > { %v916_v53 = vadd.f32 %v884_v46, %v851_v13 }
  0xd4   : > { %v981_v39 = vadd.f32 %v949_v28, %v916_v53 }
  0xd6   : > { %1013 = vst.msk [vmem:[%s1410_s28 + $0xf8] sm:$0xff] %vm171_vm0, %v981_v39 }
  0xd7 PF: > { %s13_s12 = sadd.s32 1, %s1099_s12  }
  0xd8   : > { %p10_p4 = scmp.ge.s32.totalorder %s13_s12, 4  }
  0xda   :  { %12 = sbr.rel (!%p10_p4) target bundleno = 1 (0x1), region = 64 }

</bundles_post_ra>
